<compile_context>
chip_gen: v5e
topology: v5e:2x2
jax: 0.10.0
libtpu: 0.0.40
codegen_flags: <defaults>
</compile_context>

<pallas_src>
import functools
import math

import jax
import jax.numpy as jnp
from jax import lax
from jax.experimental import pallas as pl
from jax.experimental.pallas import tpu as pltpu


_ALIGN = 16  # row-tile alignment: covers f32 (8) and bf16 (16) sublane tiling


# ----------------------------------------------------------------------------
# Small helpers
# ----------------------------------------------------------------------------

def _round_up(x, m):
    return ((x + m - 1) // m) * m


def _tpu_budget():
    """Generation-aware tiling / VMEM budget (conservative for unknown chips)."""
    try:
        kind = jax.devices()[0].device_kind.lower()
    except Exception:
        kind = ""
    if ("v5" in kind) or ("v6" in kind):
        # 128 MiB physical VMEM, single TensorCore per chip: big tiles.
        return dict(vmem_limit=100 * 1024 * 1024, block_rows=512, min_grid_steps=1)
    # v7x (64 MiB VMEM, 2 TensorCores) and anything unrecognized: conservative.
    return dict(vmem_limit=48 * 1024 * 1024, block_rows=256, min_grid_steps=2)


def _row_tile(R, budget):
    TR = min(budget["block_rows"], _round_up(R, _ALIGN))
    steps = budget["min_grid_steps"]
    if steps > 1 and R > _ALIGN:
        # Keep at least `steps` grid steps so every TensorCore gets work.
        TR = min(TR, max(_ALIGN, _round_up(-(-R // steps), _ALIGN)))
    return TR


def k_major(x):
    """(B, N, K, D) -> (K, B*N, D): neighbor axis leading, rows lane/sublane dense."""
    B, N, K, D = x.shape
    return jnp.transpose(x, (2, 0, 1, 3)).reshape(K, B * N, D)


def gather_nodes_kmajor(nodes, E_idx):
    """nodes: (B,N,C), E_idx: (B,N,K) -> gathered neighbors in K-major (K, B*N, C).

    Single XLA gather writing directly into the layout the fused kernel streams,
    so there is no per-layer (B,N,K,C) -> (K,B*N,C) transpose pass.
    """
    B, N, C = nodes.shape
    K = E_idx.shape[-1]
    idx_km = jnp.transpose(E_idx, (2, 0, 1))                    # (K, B, N)
    b_idx = jnp.arange(B).reshape(1, B, 1)
    return nodes[b_idx, idx_km].reshape(K, B * N, C)


# ----------------------------------------------------------------------------
# Pallas kernels
# ----------------------------------------------------------------------------

def _linear_kernel(x_ref, w_ref, b_ref, o_ref, *, activation):
    # bf16 operands, f32 accumulation; activation math in f32.
    y = jnp.dot(x_ref[...], w_ref[...], preferred_element_type=jnp.float32)
    y = y + b_ref[...]
    if activation == "relu":
        y = jnp.maximum(y, 0.0)
    elif activation == "log_softmax":
        y = y - jnp.max(y, axis=-1, keepdims=True)
        y = y - jnp.log(jnp.sum(jnp.exp(y), axis=-1, keepdims=True))
    o_ref[...] = y.astype(o_ref.dtype)


def pallas_linear(x, w, b, activation=None, out_dtype=jnp.float32, budget=None):
    """Row-tiled x @ w + b with optional fused relu / log_softmax."""
    budget = budget or _tpu_budget()
    R, Din = x.shape
    Dout = w.shape[1]
    TR = _row_tile(R, budget)
    Rp = _round_up(R, TR)
    if Rp != R:
        x = jnp.pad(x, ((0, Rp - R), (0, 0)))
    y = pl.pallas_call(
        functools.partial(_linear_kernel, activation=activation),
        out_shape=jax.ShapeDtypeStruct((Rp, Dout), out_dtype),
        grid=(Rp // TR,),
        in_specs=[
            pl.BlockSpec((TR, Din), lambda i: (i, 0)),
            pl.BlockSpec((Din, Dout), lambda i: (0, 0)),
            pl.BlockSpec((1, Dout), lambda i: (0, 0)),
        ],
        out_specs=pl.BlockSpec((TR, Dout), lambda i: (i, 0)),
        compiler_params=pltpu.CompilerParams(
            dimension_semantics=("parallel",),
            vmem_limit_bytes=budget["vmem_limit"]),
    )(x.astype(jnp.bfloat16), w.astype(jnp.bfloat16),
      b.reshape(1, -1).astype(jnp.float32))
    return y[:R]


def _fused_mpnn_kernel(*args, has_attend, has_blend):
    """One full MPNN layer on a (TR, H) row tile; K neighbors batched into GEMMs.

    message = W3(relu(W2(relu(W1a h_V + W1s hs + W1d hd + b1)) + b2)) + b3
              (1/scale pre-folded into W3/b3)
    dh      = sum_k [attend_k *] message_k
    h       = Norm(h_V + dh);  h = Norm(h + FFN(h));  out = mask_V * h
    """
    f32, bf16 = jnp.float32, jnp.bfloat16
    it = iter(args)
    hv_ref, hs_ref, hd_ref = next(it), next(it), next(it)
    fix_ref = next(it) if has_blend else None
    mb_ref = next(it) if has_blend else None
    ma_ref = next(it) if has_attend else None
    mv_ref = next(it)
    (w1a_ref, w1s_ref, w1d_ref, b1_ref, w2_ref, b2_ref, w3_ref, b3_ref,
     g1_ref, be1_ref, win_ref, bin_ref, wout_ref, bout_ref, g2_ref, be2_ref,
     o_ref) = it

    K, TR, Ds = hs_ref.shape
    H = hv_ref.shape[-1]

    hv = hv_ref[...]                                               # (TR, H) f32
    # Node contribution to W1, shared by all K neighbors, plus b1.
    t_node = jnp.dot(hv.astype(bf16), w1a_ref[...],
                     preferred_element_type=f32) + b1_ref[...]     # (TR, H) f32

    # Neighbor streams flattened to (K*TR, .): leading-dim collapse only
    # (TR is a sublane multiple), so no in-kernel relayout.
    hs2 = hs_ref[...].reshape(K * TR, Ds)                          # bf16
    if has_blend:
        # Decoder: mask_bw*gather(h_V) + mask_fw*gh_V0 blended in VMEM.
        # Masks are 0/1 so the bf16 blend is an exact select.
        hd2 = (hd_ref[...] * mb_ref[...] + fix_ref[...]).reshape(K * TR, H)
    else:
        hd2 = hd_ref[...].reshape(K * TR, H)                       # bf16

    # One big GEMM per weight over all K*TR neighbor rows.
    t = jnp.dot(hs2, w1s_ref[...], preferred_element_type=f32)
    t = t + jnp.dot(hd2, w1d_ref[...], preferred_element_type=f32)
    t = jnp.maximum(t.reshape(K, TR, H) + t_node[None, :, :], 0.0)
    t = t.reshape(K * TR, H).astype(bf16)
    t = jnp.maximum(jnp.dot(t, w2_ref[...], preferred_element_type=f32)
                    + b2_ref[...], 0.0).astype(bf16)
    msg = (jnp.dot(t, w3_ref[...], preferred_element_type=f32)
           + b3_ref[...]).reshape(K, TR, H)                        # f32, scale folded

    # Masked reduce over K: K unrolled (TR, H) adds.
    if has_attend:
        ma = ma_ref[...]                                           # (K, TR, 1) f32
        dh = msg[0] * ma[0]
        for k in range(1, K):
            dh = dh + msg[k] * ma[k]
    else:
        dh = msg[0]
        for k in range(1, K):
            dh = dh + msg[k]

    # Residual + Normalize + FFN + Normalize + node mask (f32, in VMEM).
    eps = 1e-6

    def norm(x, g, b):
        mu = jnp.mean(x, axis=-1, keepdims=True)
        xc = x - mu
        var = jnp.sum(xc * xc, axis=-1, keepdims=True) * (1.0 / (H - 1))
        # TODO(synk): reference Normalize source not provided; torch-style
        # unbiased variance with eps inside the rsqrt (single EUP op).
        return g * xc * lax.rsqrt(var + eps) + b

    h = norm(hv + dh, g1_ref[...], be1_ref[...])
    ff = jnp.maximum(jnp.dot(h.astype(bf16), win_ref[...],
                             preferred_element_type=f32) + bin_ref[...], 0.0)
    ff = jnp.dot(ff.astype(bf16), wout_ref[...],
                 preferred_element_type=f32) + bout_ref[...]
    h = norm(h + ff, g2_ref[...], be2_ref[...])
    o_ref[...] = (h * mv_ref[...]).astype(o_ref.dtype)


def _fused_rows(R, K, Ds, H, budget, has_blend):
    """Row tile for the fused layer: block_rows / min-grid-steps limits plus a
    rough VMEM working-set cap (double-buffered streams + f32 temporaries)."""
    io = 2 * (4 * H                                   # h_V (f32)
              + 2 * K * Ds                            # static stream (bf16)
              + 2 * K * H                             # gathered stream (bf16)
              + (2 * K * H + 2 * K if has_blend else 4 * K)  # fix+mb | attend
              + 4 + 4 * H)                            # mask_V + output
    tmp = 3 * 4 * K * H + 4 * 4 * H + 8 * H           # in-kernel f32 temporaries
    per_row = io + tmp
    cap = max(_ALIGN,
              ((int(budget["vmem_limit"] * 0.6) // per_row) // _ALIGN) * _ALIGN)
    TR = min(_row_tile(R, budget), cap)
    return TR, _round_up(R, TR)


def fused_mpnn_layer(p, h_V, hs_km, hd_km, mask_V, *, attend_km=None,
                     blend_mask_km=None, blend_fix_km=None, scale=30.0,
                     budget=None):
    """Fused MPNN layer over flattened rows R = B*N.

    h_V:          (R, H)     f32  node features / residual stream
    hs_km:        (K, R, Ds) bf16 static neighbor stream (edges [+ masked seq])
    hd_km:        (K, R, H)  bf16 gathered-node stream (pre-blend for decoder)
    mask_V:       (R, 1)     f32
    attend_km:    (K, R, 1)  f32  encoder attend mask (None for decoder)
    blend_mask_km/blend_fix_km: (K,R,1)/(K,R,H) bf16 decoder autoregressive blend
    """
    budget = budget or _tpu_budget()
    R, H = h_V.shape
    K, _, Ds = hs_km.shape
    H4 = p["Win"].shape[1]
    f32, bf16 = jnp.float32, jnp.bfloat16
    has_blend = blend_mask_km is not None
    has_attend = attend_km is not None

    TR, Rp = _fused_rows(R, K, Ds, H, budget, has_blend)

    def pad_rows(a, axis):
        if Rp == R:
            return a
        pad = [(0, 0)] * a.ndim
        pad[axis] = (0, Rp - R)
        return jnp.pad(a, pad)

    inputs = [pad_rows(h_V.astype(f32), 0), pad_rows(hs_km, 1), pad_rows(hd_km, 1)]
    in_specs = [
        pl.BlockSpec((TR, H), lambda i: (i, 0)),            # h_V
        pl.BlockSpec((K, TR, Ds), lambda i: (0, i, 0)),     # static neighbor stream
        pl.BlockSpec((K, TR, H), lambda i: (0, i, 0)),      # gathered-node stream
    ]
    if has_blend:
        inputs += [pad_rows(blend_fix_km, 1), pad_rows(blend_mask_km, 1)]
        in_specs += [pl.BlockSpec((K, TR, H), lambda i: (0, i, 0)),   # fix stream
                     pl.BlockSpec((K, TR, 1), lambda i: (0, i, 0))]   # mask_bw
    if has_attend:
        inputs += [pad_rows(attend_km.astype(f32), 1)]
        in_specs += [pl.BlockSpec((K, TR, 1), lambda i: (0, i, 0))]   # mask_attend
    inputs += [pad_rows(mask_V.astype(f32), 0)]
    in_specs += [pl.BlockSpec((TR, 1), lambda i: (i, 0))]             # mask_V

    inv_s = 1.0 / scale
    row = lambda v: v.reshape(1, -1).astype(f32)
    wb = lambda v: v.astype(bf16)
    weights = [
        wb(p["W1a"]), wb(p["W1s"]), wb(p["W1d"]), row(p["b1"]),
        wb(p["W2"]), row(p["b2"]),
        wb(p["W3"] * inv_s), row(p["b3"] * inv_s),      # 1/scale folded
        row(p["g1"]), row(p["be1"]),
        wb(p["Win"]), row(p["b_in"]), wb(p["Wout"]), row(p["b_out"]),
        row(p["g2"]), row(p["be2"]),
    ]
    # Weight/bias blocks are grid-invariant: Pallas skips the re-fetch when the
    # block index does not change between grid steps.
    weight_specs = [
        pl.BlockSpec((H, H), lambda i: (0, 0)),      # W1a (node part)
        pl.BlockSpec((Ds, H), lambda i: (0, 0)),     # W1s (static part)
        pl.BlockSpec((H, H), lambda i: (0, 0)),      # W1d (gathered part)
        pl.BlockSpec((1, H), lambda i: (0, 0)),      # b1
        pl.BlockSpec((H, H), lambda i: (0, 0)),      # W2
        pl.BlockSpec((1, H), lambda i: (0, 0)),      # b2
        pl.BlockSpec((H, H), lambda i: (0, 0)),      # W3
        pl.BlockSpec((1, H), lambda i: (0, 0)),      # b3
        pl.BlockSpec((1, H), lambda i: (0, 0)),      # gamma1
        pl.BlockSpec((1, H), lambda i: (0, 0)),      # beta1
        pl.BlockSpec((H, H4), lambda i: (0, 0)),     # FFN W_in
        pl.BlockSpec((1, H4), lambda i: (0, 0)),     # FFN b_in
        pl.BlockSpec((H4, H), lambda i: (0, 0)),     # FFN W_out
        pl.BlockSpec((1, H), lambda i: (0, 0)),      # FFN b_out
        pl.BlockSpec((1, H), lambda i: (0, 0)),      # gamma2
        pl.BlockSpec((1, H), lambda i: (0, 0)),      # beta2
    ]

    out = pl.pallas_call(
        functools.partial(_fused_mpnn_kernel,
                          has_attend=has_attend, has_blend=has_blend),
        out_shape=jax.ShapeDtypeStruct((Rp, H), f32),
        grid=(Rp // TR,),
        in_specs=in_specs + weight_specs,
        out_specs=pl.BlockSpec((TR, H), lambda i: (i, 0)),
        compiler_params=pltpu.CompilerParams(
            dimension_semantics=("parallel",),
            vmem_limit_bytes=budget["vmem_limit"]),
    )(*inputs, *weights)
    return out[:R]


# ----------------------------------------------------------------------------
# Features (JAX glue)
# ----------------------------------------------------------------------------

def protein_features(X, L, mask, cfg):
    # TODO(synk): ProteinFeatures source not provided; approximated with kNN by
    # C-alpha distance, RBF edge features, and sinusoidal node features.
    K = cfg["k"]
    NF, EF = cfg["node_features"], cfg["edge_features"]
    Ca = X[:, :, 1, :]                                         # (B, N, 3)
    d = Ca[:, :, None, :] - Ca[:, None, :, :]
    D = jnp.sqrt(jnp.sum(d * d, axis=-1) + 1e-6)               # (B, N, N)
    mask2 = mask[:, :, None] * mask[:, None, :]
    D_masked = jnp.where(mask2 > 0, D, 1e6)
    _, E_idx = jax.lax.top_k(-D_masked, K)                     # (B, N, K)
    D_k = jnp.take_along_axis(D, E_idx, axis=-1)               # (B, N, K)
    D_mu = jnp.linspace(0.0, 20.0, EF)
    D_sigma = 20.0 / EF
    E = jnp.exp(-((D_k[..., None] - D_mu) / D_sigma) ** 2)     # (B, N, K, EF)
    proj = jnp.linspace(0.1, 1.0, 3 * (NF // 2),
                        dtype=jnp.float32).reshape(3, NF // 2)
    ang = jnp.einsum("bnd,df->bnf", Ca, proj)
    V = jnp.concatenate([jnp.sin(ang), jnp.cos(ang)], axis=-1)  # (B, N, NF)
    return V.astype(jnp.float32), E.astype(jnp.float32), E_idx


# ----------------------------------------------------------------------------
# Parameters (deterministic, xavier-uniform for matrices, zeros for biases)
# ----------------------------------------------------------------------------

def _xavier(key, shape):
    lim = math.sqrt(6.0 / (shape[0] + shape[-1]))
    return jax.random.uniform(key, shape, jnp.float32, -lim, lim)


def _init_mpnn_layer(key, H, num_in):
    # W1 of Linear(H + num_in, H) is stored split: node part (H), static edge
    # part (num_in - H), gathered-node part (H).
    ks = jax.random.split(key, 7)
    Ds = num_in - H
    return dict(
        W1a=_xavier(ks[0], (H, H)),
        W1s=_xavier(ks[1], (Ds, H)),
        W1d=_xavier(ks[2], (H, H)),
        b1=jnp.zeros((H,), jnp.float32),
        W2=_xavier(ks[3], (H, H)), b2=jnp.zeros((H,), jnp.float32),
        W3=_xavier(ks[4], (H, H)), b3=jnp.zeros((H,), jnp.float32),
        g1=jnp.ones((H,), jnp.float32), be1=jnp.zeros((H,), jnp.float32),
        g2=jnp.ones((H,), jnp.float32), be2=jnp.zeros((H,), jnp.float32),
        Win=_xavier(ks[5], (H, 4 * H)), b_in=jnp.zeros((4 * H,), jnp.float32),
        Wout=_xavier(ks[6], (4 * H, H)), b_out=jnp.zeros((H,), jnp.float32),
    )


def init_params(key, cfg):
    H, NF, EF, Z = cfg["hidden"], cfg["node_features"], cfg["edge_features"], cfg["z_dim"]
    ks = jax.random.split(key, 16)
    enc = [_init_mpnn_layer(k, H, 2 * H)
           for k in jax.random.split(ks[10], cfg["num_encoder_layers"])]
    dec = [_init_mpnn_layer(k, H, 3 * H)
           for k in jax.random.split(ks[11], cfg["num_decoder_layers"])]
    return dict(
        W_v=_xavier(ks[0], (NF, H)), b_v=jnp.zeros((H,), jnp.float32),
        W_e=_xavier(ks[1], (EF, H)), b_e=jnp.zeros((H,), jnp.float32),
        W_s_emb=_xavier(ks[2], (cfg["vocab"], H)),
        fc_mu=_xavier(ks[3], (H, Z)), b_mu=jnp.zeros((Z,), jnp.float32),
        fc_sig=_xavier(ks[4], (H, Z)), b_sig=jnp.zeros((Z,), jnp.float32),
        gen_Wz=_xavier(ks[5], (Z, H)), gen_bz=jnp.zeros((H,), jnp.float32),
        gen_Wc=_xavier(ks[6], (2 * H, H)), gen_bc=jnp.zeros((H,), jnp.float32),
        recon_W=_xavier(ks[7], (H, 3)), recon_b=jnp.zeros((3,), jnp.float32),
        fc_dec_W=_xavier(ks[8], (Z, H)), fc_dec_b=jnp.zeros((H,), jnp.float32),
        Wout=_xavier(ks[9], (H, cfg["num_letters"])),
        bout=jnp.zeros((cfg["num_letters"],), jnp.float32),
        enc_layers=enc, dec_layers=dec,
    )


# ----------------------------------------------------------------------------
# Struct2Seq forward
# ----------------------------------------------------------------------------

def struct2seq_forward(params, X, S, L, mask, key_eps, *, cfg):
    B, N = mask.shape
    H, K = cfg["hidden"], cfg["k"]
    R = B * N
    f32, bf16 = jnp.float32, jnp.bfloat16
    budget = _tpu_budget()

    # Features + input embeddings (edge embedding produced straight in K-major).
    V, E, E_idx = protein_features(X, L, mask, cfg)
    h_V = pallas_linear(V.reshape(R, -1), params["W_v"], params["b_v"],
                        budget=budget)                                 # (R, H)
    E_km = k_major(E)                                                  # (K, R, EF)
    h_E_km = pallas_linear(E_km.reshape(K * R, -1), params["W_e"],
                           params["b_e"], budget=budget).reshape(K, R, H)

    # Encoder masks; dropout is identity at inference.
    mv = mask.reshape(R, 1).astype(f32)
    gm_km = gather_nodes_kmajor(mask[..., None], E_idx)                # (K, R, 1)
    ma_km = mask.reshape(1, R, 1) * gm_km                              # attend mask
    hE_b = h_E_km.astype(bf16)                 # static stream, constant across layers

    # Encoder: h_EV = [h_E | gather(h_V)] is never materialized; the two streams
    # feed the split W1 and the gathered stream is regenerated per layer.
    # TODO(synk): a scalar-prefetched E_idx + in-kernel DMA gather would also
    # remove this per-layer (K,R,H) HBM round trip.
    gh_last = gather_nodes_kmajor(h_V.reshape(B, N, H), E_idx)
    for lp in params["enc_layers"]:
        gh_last = gather_nodes_kmajor(h_V.reshape(B, N, H), E_idx)     # pre-update h_V
        h_V = fused_mpnn_layer(lp, h_V, hE_b, gh_last.astype(bf16), mv,
                               attend_km=ma_km, budget=budget)

    # Latent heads (tiny dense layers -> plain XLA, not worth a pallas_call).
    hv_last = h_V.reshape(B, N, H)[:, -1, :]
    mu = hv_last @ params["fc_mu"] + params["b_mu"]
    sig = hv_last @ params["fc_sig"] + params["b_sig"]
    eps_z = jax.random.normal(key_eps, mu.shape, f32)
    sample = mu + eps_z * jnp.exp(0.5 * sig)

    # TODO(synk): LSTMLayer2 ("generator") source not provided; deterministic
    # gated stand-in conditioned on z and the reference's last-iteration
    # h_EV = [h_E, gather(h_V entering the final encoder layer)] (= gh_last).
    ctx = jnp.concatenate([jnp.mean(h_E_km, axis=0), jnp.mean(gh_last, axis=0)],
                          axis=-1)                                     # (R, 2H)
    g_ctx = ctx @ params["gen_Wc"] + params["gen_bc"]
    g_z = sample @ params["gen_Wz"] + params["gen_bz"]
    h_gen = jnp.tanh(g_ctx.reshape(B, N, H) + g_z[:, None, :]) * mask[..., None]
    point = h_gen.reshape(R, H) @ params["recon_W"] + params["recon_b"]
    recon_V = jnp.arctan2(jnp.sin(point), jnp.cos(point)).reshape(B, N, 3)

    # Decoder init.
    mu_b = jnp.broadcast_to(mu[:, None, :], (B, N, mu.shape[-1]))
    h_Vd = mu_b.reshape(R, -1) @ params["fc_dec_W"] + params["fc_dec_b"]   # (R, H)
    h_S = params["W_s_emb"][S]                                         # (B, N, H)
    ghS_km = gather_nodes_kmajor(h_S, E_idx)                           # (K, R, H)
    ghV0_km = gather_nodes_kmajor(h_Vd.reshape(B, N, H), E_idx)        # (K, R, H)

    idx_km = jnp.transpose(E_idx, (2, 0, 1))                           # (K, B, N)
    auto_km = (idx_km < jnp.arange(N).reshape(1, 1, N)).astype(f32).reshape(K, R, 1)
    m1 = mask.reshape(1, R, 1).astype(f32)
    bw_km = m1 * auto_km
    fw_km = m1 * (1.0 - auto_km)

    # h_ESV = mask_bw*[h_E, gh_S, gh_V] + mask_fw*[h_E, 0, gh_V0] decomposed as:
    #   static 2H stream (layer-invariant):  [mask*h_E | mask_bw*gh_S]
    #   dynamic H stream (blended IN-KERNEL): mask_bw*gather(h_V) + mask_fw*gh_V0
    hs_dec = jnp.concatenate([m1 * h_E_km, bw_km * ghS_km], axis=-1).astype(bf16)
    fix_km = (fw_km * ghV0_km).astype(bf16)
    bw_b = bw_km.astype(bf16)

    for lp in params["dec_layers"]:
        gh_km = gather_nodes_kmajor(h_Vd.reshape(B, N, H), E_idx)
        h_Vd = fused_mpnn_layer(lp, h_Vd, hs_dec, gh_km.astype(bf16), mv,
                                blend_mask_km=bw_b, blend_fix_km=fix_km,
                                budget=budget)

    # Output head: lane-pad logits to a multiple of 128, padded columns get a
    # -1e30 bias so they vanish in the fused (f32) log_softmax, then slice back.
    n_letters = params["Wout"].shape[1]
    Dp = _round_up(n_letters, 128)
    W_out_p = jnp.pad(params["Wout"], ((0, 0), (0, Dp - n_letters)))
    b_out_p = jnp.pad(params["bout"], ((0, Dp - n_letters),), constant_values=-1e30)
    logp = pallas_linear(h_Vd, W_out_p, b_out_p, activation="log_softmax",
                         budget=budget)
    log_probs = logp[:, :n_letters].reshape(B, N, n_letters)
    return recon_V, log_probs, mu, sig


# ----------------------------------------------------------------------------
# Main
# ----------------------------------------------------------------------------

if __name__ == "__main__":
    cfg = dict(hidden=32, node_features=16, edge_features=16, z_dim=8, k=4,
               vocab=20, num_letters=20, num_encoder_layers=1, num_decoder_layers=1)
    key = jax.random.PRNGKey(0)
    kp, kx, ks_, keps = jax.random.split(key, 4)
    params = init_params(kp, cfg)

    B, N = 2, 8
    X = jax.random.normal(kx, (B, N, 4, 3), jnp.float32) * 3.0   # backbone coords
    S = jax.random.randint(ks_, (B, N), 0, cfg["vocab"])         # sequence tokens
    L = jnp.array([N, N - 2], jnp.int32)                         # lengths
    mask = (jnp.arange(N)[None, :] < L[:, None]).astype(jnp.float32)

    forward = jax.jit(functools.partial(struct2seq_forward, cfg=cfg))
    recon_V, log_probs, mu, sig = forward(params, X, S, L, mask, keps)
    jax.block_until_ready((recon_V, log_probs, mu, sig))
    assert recon_V.shape == (B, N, 3)
    assert log_probs.shape == (B, N, cfg["num_letters"])
    assert mu.shape == (B, cfg["z_dim"]) and sig.shape == (B, cfg["z_dim"])
    assert bool(jnp.all(jnp.isfinite(log_probs))) and bool(jnp.all(jnp.isfinite(recon_V)))
    print("KERNEL_OK")
</pallas_src>

<mosaic_0001>
module attributes {stable_mosaic.version = 11 : i64} {
  func.func @_linear_kernel(%arg0: i32, %arg1: memref<16x16xbf16, #tpu.memory_space<vmem>>, %arg2: memref<16x32xbf16, #tpu.memory_space<vmem>>, %arg3: memref<1x32xf32, #tpu.memory_space<vmem>>, %arg4: memref<16x32xf32, #tpu.memory_space<vmem>>) attributes {dimension_semantics = [#tpu.dimension_semantics<parallel>], iteration_bounds = array<i64: 1>, scalar_prefetch = 0 : i64, scratch_operands = 0 : i64, tpu.core_type = #tpu.core_type<tc>, window_params = [{transform_indices = @transform_0, window_bounds = array<i64: 16, 16>}, {pipeline_mode = #tpu.pipeline_mode<synchronous>, transform_indices = @transform_1, window_bounds = array<i64: 16, 32>}, {pipeline_mode = #tpu.pipeline_mode<synchronous>, transform_indices = @transform_2, window_bounds = array<i64: 1, 32>}, {transform_indices = @transform_3, window_bounds = array<i64: 16, 32>}]} {
    %c0 = arith.constant 0 : index
    %c0_0 = arith.constant 0 : index
    %0 = vector.load %arg1[%c0, %c0_0] : memref<16x16xbf16, #tpu.memory_space<vmem>>, vector<16x16xbf16>
    %c0_1 = arith.constant 0 : index
    %c0_2 = arith.constant 0 : index
    %1 = vector.load %arg2[%c0_1, %c0_2] : memref<16x32xbf16, #tpu.memory_space<vmem>>, vector<16x32xbf16>
    %cst = arith.constant dense<0.000000e+00> : vector<16x32xf32>
    %2 = tpu.matmul %0, %1, %cst {dimension_numbers = #tpu.dot_dimension_numbers<[1], [0], [0], [1], [0, 0, 1, 1], [], []>} : vector<16x16xbf16>, vector<16x32xbf16>, vector<16x32xf32> -> vector<16x32xf32>
    %c0_3 = arith.constant 0 : index
    %c0_4 = arith.constant 0 : index
    %3 = vector.load %arg3[%c0_3, %c0_4] : memref<1x32xf32, #tpu.memory_space<vmem>>, vector<1x32xf32>
    %4 = vector.broadcast %3 : vector<1x32xf32> to vector<16x32xf32>
    %5 = arith.addf %2, %4 : vector<16x32xf32>
    %c0_5 = arith.constant 0 : index
    %c0_6 = arith.constant 0 : index
    %6 = vector.load %arg4[%c0_5, %c0_6] : memref<16x32xf32, #tpu.memory_space<vmem>>, vector<16x32xf32>
    tpu.vector_store %arg4[%c0_5, %c0_6], %5 {strides = array<i32>} : memref<16x32xf32, #tpu.memory_space<vmem>>, vector<16x32xf32>,
    return
  }
  func.func @transform_0(%arg0: i32) -> (i32, i32) {
    %c0_i32 = arith.constant 0 : i32
    %c0_i32_0 = arith.constant 0 : i32
    return %arg0, %c0_i32 : i32, i32
  }
  func.func @transform_1(%arg0: i32) -> (i32, i32) {
    %c0_i32 = arith.constant 0 : i32
    %c0_i32_0 = arith.constant 0 : i32
    %c0_i32_1 = arith.constant 0 : i32
    return %c0_i32, %c0_i32_0 : i32, i32
  }
  func.func @transform_2(%arg0: i32) -> (i32, i32) {
    %c0_i32 = arith.constant 0 : i32
    %c0_i32_0 = arith.constant 0 : i32
    %c0_i32_1 = arith.constant 0 : i32
    return %c0_i32, %c0_i32_0 : i32, i32
  }
  func.func @transform_3(%arg0: i32) -> (i32, i32) {
    %c0_i32 = arith.constant 0 : i32
    %c0_i32_0 = arith.constant 0 : i32
    return %arg0, %c0_i32 : i32, i32
  }
}

module attributes {stable_mosaic.version = 11 : i64} {
  func.func @_linear_kernel(%arg0: i32, %arg1: memref<32x16xbf16, #tpu.memory_space<vmem>>, %arg2: memref<16x32xbf16, #tpu.memory_space<vmem>>, %arg3: memref<1x32xf32, #tpu.memory_space<vmem>>, %arg4: memref<32x32xf32, #tpu.memory_space<vmem>>) attributes {dimension_semantics = [#tpu.dimension_semantics<parallel>], iteration_bounds = array<i64: 2>, scalar_prefetch = 0 : i64, scratch_operands = 0 : i64, tpu.core_type = #tpu.core_type<tc>, window_params = [{transform_indices = @transform_0, window_bounds = array<i64: 32, 16>}, {pipeline_mode = #tpu.pipeline_mode<synchronous>, transform_indices = @transform_1, window_bounds = array<i64: 16, 32>}, {pipeline_mode = #tpu.pipeline_mode<synchronous>, transform_indices = @transform_2, window_bounds = array<i64: 1, 32>}, {transform_indices = @transform_3, window_bounds = array<i64: 32, 32>}]} {
    %c0 = arith.constant 0 : index
    %c0_0 = arith.constant 0 : index
    %0 = vector.load %arg1[%c0, %c0_0] : memref<32x16xbf16, #tpu.memory_space<vmem>>, vector<32x16xbf16>
    %c0_1 = arith.constant 0 : index
    %c0_2 = arith.constant 0 : index
    %1 = vector.load %arg2[%c0_1, %c0_2] : memref<16x32xbf16, #tpu.memory_space<vmem>>, vector<16x32xbf16>
    %cst = arith.constant dense<0.000000e+00> : vector<32x32xf32>
    %2 = tpu.matmul %0, %1, %cst {dimension_numbers = #tpu.dot_dimension_numbers<[1], [0], [0], [1], [0, 0, 1, 1], [], []>} : vector<32x16xbf16>, vector<16x32xbf16>, vector<32x32xf32> -> vector<32x32xf32>
    %c0_3 = arith.constant 0 : index
    %c0_4 = arith.constant 0 : index
    %3 = vector.load %arg3[%c0_3, %c0_4] : memref<1x32xf32, #tpu.memory_space<vmem>>, vector<1x32xf32>
    %4 = vector.broadcast %3 : vector<1x32xf32> to vector<32x32xf32>
    %5 = arith.addf %2, %4 : vector<32x32xf32>
    %c0_5 = arith.constant 0 : index
    %c0_6 = arith.constant 0 : index
    %6 = vector.load %arg4[%c0_5, %c0_6] : memref<32x32xf32, #tpu.memory_space<vmem>>, vector<32x32xf32>
    tpu.vector_store %arg4[%c0_5, %c0_6], %5 {strides = array<i32>} : memref<32x32xf32, #tpu.memory_space<vmem>>, vector<32x32xf32>,
    return
  }
  func.func @transform_0(%arg0: i32) -> (i32, i32) {
    %c0_i32 = arith.constant 0 : i32
    %c0_i32_0 = arith.constant 0 : i32
    return %arg0, %c0_i32 : i32, i32
  }
  func.func @transform_1(%arg0: i32) -> (i32, i32) {
    %c0_i32 = arith.constant 0 : i32
    %c0_i32_0 = arith.constant 0 : i32
    %c0_i32_1 = arith.constant 0 : i32
    return %c0_i32, %c0_i32_0 : i32, i32
  }
  func.func @transform_2(%arg0: i32) -> (i32, i32) {
    %c0_i32 = arith.constant 0 : i32
    %c0_i32_0 = arith.constant 0 : i32
    %c0_i32_1 = arith.constant 0 : i32
    return %c0_i32, %c0_i32_0 : i32, i32
  }
  func.func @transform_3(%arg0: i32) -> (i32, i32) {
    %c0_i32 = arith.constant 0 : i32
    %c0_i32_0 = arith.constant 0 : i32
    return %arg0, %c0_i32 : i32, i32
  }
}

module attributes {stable_mosaic.version = 11 : i64} {
  func.func @_fused_mpnn_kernel(%arg0: i32, %arg1: memref<16x32xf32, #tpu.memory_space<vmem>>, %arg2: memref<4x16x32xbf16, #tpu.memory_space<vmem>>, %arg3: memref<4x16x32xbf16, #tpu.memory_space<vmem>>, %arg4: memref<4x16x1xf32, #tpu.memory_space<vmem>>, %arg5: memref<16x1xf32, #tpu.memory_space<vmem>>, %arg6: memref<32x32xbf16, #tpu.memory_space<vmem>>, %arg7: memref<32x32xbf16, #tpu.memory_space<vmem>>, %arg8: memref<32x32xbf16, #tpu.memory_space<vmem>>, %arg9: memref<1x32xf32, #tpu.memory_space<vmem>>, %arg10: memref<32x32xbf16, #tpu.memory_space<vmem>>, %arg11: memref<1x32xf32, #tpu.memory_space<vmem>>, %arg12: memref<32x32xbf16, #tpu.memory_space<vmem>>, %arg13: memref<1x32xf32, #tpu.memory_space<vmem>>, %arg14: memref<1x32xf32, #tpu.memory_space<vmem>>, %arg15: memref<1x32xf32, #tpu.memory_space<vmem>>, %arg16: memref<32x128xbf16, #tpu.memory_space<vmem>>, %arg17: memref<1x128xf32, #tpu.memory_space<vmem>>, %arg18: memref<128x32xbf16, #tpu.memory_space<vmem>>, %arg19: memref<1x32xf32, #tpu.memory_space<vmem>>, %arg20: memref<1x32xf32, #tpu.memory_space<vmem>>, %arg21: memref<1x32xf32, #tpu.memory_space<vmem>>, %arg22: memref<16x32xf32, #tpu.memory_space<vmem>>) attributes {dimension_semantics = [#tpu.dimension_semantics<parallel>], iteration_bounds = array<i64: 1>, scalar_prefetch = 0 : i64, scratch_operands = 0 : i64, tpu.core_type = #tpu.core_type<tc>, window_params = [{transform_indices = @transform_0, window_bounds = array<i64: 16, 32>}, {transform_indices = @transform_1, window_bounds = array<i64: 4, 16, 32>}, {transform_indices = @transform_2, window_bounds = array<i64: 4, 16, 32>}, {transform_indices = @transform_3, window_bounds = array<i64: 4, 16, 1>}, {transform_indices = @transform_4, window_bounds = array<i64: 16, 1>}, {pipeline_mode = #tpu.pipeline_mode<synchronous>, transform_indices = @transform_5, window_bounds = array<i64: 32, 32>}, {pipeline_mode = #tpu.pipeline_mode<synchronous>, transform_indices = @transform_6, window_bounds = array<i64: 32, 32>}, {pipeline_mode = #tpu.pipeline_mode<synchronous>, transform_indices = @transform_7, window_bounds = array<i64: 32, 32>}, {pipeline_mode = #tpu.pipeline_mode<synchronous>, transform_indices = @transform_8, window_bounds = array<i64: 1, 32>}, {pipeline_mode = #tpu.pipeline_mode<synchronous>, transform_indices = @transform_9, window_bounds = array<i64: 32, 32>}, {pipeline_mode = #tpu.pipeline_mode<synchronous>, transform_indices = @transform_10, window_bounds = array<i64: 1, 32>}, {pipeline_mode = #tpu.pipeline_mode<synchronous>, transform_indices = @transform_11, window_bounds = array<i64: 32, 32>}, {pipeline_mode = #tpu.pipeline_mode<synchronous>, transform_indices = @transform_12, window_bounds = array<i64: 1, 32>}, {pipeline_mode = #tpu.pipeline_mode<synchronous>, transform_indices = @transform_13, window_bounds = array<i64: 1, 32>}, {pipeline_mode = #tpu.pipeline_mode<synchronous>, transform_indices = @transform_14, window_bounds = array<i64: 1, 32>}, {pipeline_mode = #tpu.pipeline_mode<synchronous>, transform_indices = @transform_15, window_bounds = array<i64: 32, 128>}, {pipeline_mode = #tpu.pipeline_mode<synchronous>, transform_indices = @transform_16, window_bounds = array<i64: 1, 128>}, {pipeline_mode = #tpu.pipeline_mode<synchronous>, transform_indices = @transform_17, window_bounds = array<i64: 128, 32>}, {pipeline_mode = #tpu.pipeline_mode<synchronous>, transform_indices = @transform_18, window_bounds = array<i64: 1, 32>}, {pipeline_mode = #tpu.pipeline_mode<synchronous>, transform_indices = @transform_19, window_bounds = array<i64: 1, 32>}, {pipeline_mode = #tpu.pipeline_mode<synchronous>, transform_indices = @transform_20, window_bounds = array<i64: 1, 32>}, {transform_indices = @transform_21, window_bounds = array<i64: 16, 32>}]} {
    %c0 = arith.constant 0 : index
    %c0_0 = arith.constant 0 : index
    %0 = vector.load %arg1[%c0, %c0_0] : memref<16x32xf32, #tpu.memory_space<vmem>>, vector<16x32xf32>
    %1 = arith.truncf %0 : vector<16x32xf32> to vector<16x32xbf16>
    %c0_1 = arith.constant 0 : index
    %c0_2 = arith.constant 0 : index
    %2 = vector.load %arg6[%c0_1, %c0_2] : memref<32x32xbf16, #tpu.memory_space<vmem>>, vector<32x32xbf16>
    %cst = arith.constant dense<0.000000e+00> : vector<16x32xf32>
    %3 = tpu.matmul %1, %2, %cst {dimension_numbers = #tpu.dot_dimension_numbers<[1], [0], [0], [1], [0, 0, 1, 1], [], []>} : vector<16x32xbf16>, vector<32x32xbf16>, vector<16x32xf32> -> vector<16x32xf32>
    %c0_3 = arith.constant 0 : index
    %c0_4 = arith.constant 0 : index
    %4 = vector.load %arg9[%c0_3, %c0_4] : memref<1x32xf32, #tpu.memory_space<vmem>>, vector<1x32xf32>
    %5 = vector.broadcast %4 : vector<1x32xf32> to vector<16x32xf32>
    %6 = arith.addf %3, %5 : vector<16x32xf32>
    %c0_5 = arith.constant 0 : index
    %c0_6 = arith.constant 0 : index
    %c0_7 = arith.constant 0 : index
    %7 = vector.load %arg2[%c0_5, %c0_6, %c0_7] : memref<4x16x32xbf16, #tpu.memory_space<vmem>>, vector<4x16x32xbf16>
    %8 = vector.shape_cast %7 : vector<4x16x32xbf16> to vector<64x32xbf16>
    %c0_8 = arith.constant 0 : index
    %c0_9 = arith.constant 0 : index
    %c0_10 = arith.constant 0 : index
    %9 = vector.load %arg3[%c0_8, %c0_9, %c0_10] : memref<4x16x32xbf16, #tpu.memory_space<vmem>>, vector<4x16x32xbf16>
    %10 = vector.shape_cast %9 : vector<4x16x32xbf16> to vector<64x32xbf16>
    %c0_11 = arith.constant 0 : index
    %c0_12 = arith.constant 0 : index
    %11 = vector.load %arg7[%c0_11, %c0_12] : memref<32x32xbf16, #tpu.memory_space<vmem>>, vector<32x32xbf16>
    %cst_13 = arith.constant dense<0.000000e+00> : vector<64x32xf32>
    %12 = tpu.matmul %8, %11, %cst_13 {dimension_numbers = #tpu.dot_dimension_numbers<[1], [0], [0], [1], [0, 0, 1, 1], [], []>} : vector<64x32xbf16>, vector<32x32xbf16>, vector<64x32xf32> -> vector<64x32xf32>
    %c0_14 = arith.constant 0 : index
    %c0_15 = arith.constant 0 : index
    %13 = vector.load %arg8[%c0_14, %c0_15] : memref<32x32xbf16, #tpu.memory_space<vmem>>, vector<32x32xbf16>
    %cst_16 = arith.constant dense<0.000000e+00> : vector<64x32xf32>
    %14 = tpu.matmul %10, %13, %cst_16 {dimension_numbers = #tpu.dot_dimension_numbers<[1], [0], [0], [1], [0, 0, 1, 1], [], []>} : vector<64x32xbf16>, vector<32x32xbf16>, vector<64x32xf32> -> vector<64x32xf32>
    %15 = arith.addf %12, %14 : vector<64x32xf32>
    %16 = vector.shape_cast %15 : vector<64x32xf32> to vector<4x16x32xf32>
    %17 = vector.shape_cast %6 : vector<16x32xf32> to vector<1x16x32xf32>
    %18 = vector.broadcast %17 : vector<1x16x32xf32> to vector<4x16x32xf32>
    %19 = arith.addf %16, %18 : vector<4x16x32xf32>
    %cst_17 = arith.constant 0.000000e+00 : f32
    %20 = vector.broadcast %cst_17 : f32 to vector<4x16x32xf32>
    %21 = arith.maximumf %19, %20 : vector<4x16x32xf32>
    %22 = vector.shape_cast %21 : vector<4x16x32xf32> to vector<64x32xf32>
    %23 = arith.truncf %22 : vector<64x32xf32> to vector<64x32xbf16>
    %c0_18 = arith.constant 0 : index
    %c0_19 = arith.constant 0 : index
    %24 = vector.load %arg10[%c0_18, %c0_19] : memref<32x32xbf16, #tpu.memory_space<vmem>>, vector<32x32xbf16>
    %cst_20 = arith.constant dense<0.000000e+00> : vector<64x32xf32>
    %25 = tpu.matmul %23, %24, %cst_20 {dimension_numbers = #tpu.dot_dimension_numbers<[1], [0], [0], [1], [0, 0, 1, 1], [], []>} : vector<64x32xbf16>, vector<32x32xbf16>, vector<64x32xf32> -> vector<64x32xf32>
    %c0_21 = arith.constant 0 : index
    %c0_22 = arith.constant 0 : index
    %26 = vector.load %arg11[%c0_21, %c0_22] : memref<1x32xf32, #tpu.memory_space<vmem>>, vector<1x32xf32>
    %27 = vector.broadcast %26 : vector<1x32xf32> to vector<64x32xf32>
    %28 = arith.addf %25, %27 : vector<64x32xf32>
    %cst_23 = arith.constant 0.000000e+00 : f32
    %29 = vector.broadcast %cst_23 : f32 to vector<64x32xf32>
    %30 = arith.maximumf %28, %29 : vector<64x32xf32>
    %31 = arith.truncf %30 : vector<64x32xf32> to vector<64x32xbf16>
    %c0_24 = arith.constant 0 : index
    %c0_25 = arith.constant 0 : index
    %32 = vector.load %arg12[%c0_24, %c0_25] : memref<32x32xbf16, #tpu.memory_space<vmem>>, vector<32x32xbf16>
    %cst_26 = arith.constant dense<0.000000e+00> : vector<64x32xf32>
    %33 = tpu.matmul %31, %32, %cst_26 {dimension_numbers = #tpu.dot_dimension_numbers<[1], [0], [0], [1], [0, 0, 1, 1], [], []>} : vector<64x32xbf16>, vector<32x32xbf16>, vector<64x32xf32> -> vector<64x32xf32>
    %c0_27 = arith.constant 0 : index
    %c0_28 = arith.constant 0 : index
    %34 = vector.load %arg13[%c0_27, %c0_28] : memref<1x32xf32, #tpu.memory_space<vmem>>, vector<1x32xf32>
    %35 = vector.broadcast %34 : vector<1x32xf32> to vector<64x32xf32>
    %36 = arith.addf %33, %35 : vector<64x32xf32>
    %37 = vector.shape_cast %36 : vector<64x32xf32> to vector<4x16x32xf32>
    %c0_29 = arith.constant 0 : index
    %c0_30 = arith.constant 0 : index
    %c0_31 = arith.constant 0 : index
    %38 = vector.load %arg4[%c0_29, %c0_30, %c0_31] : memref<4x16x1xf32, #tpu.memory_space<vmem>>, vector<4x16x1xf32>
    %39 = vector.extract_strided_slice %37 {offsets = [0, 0, 0], sizes = [1, 16, 32], strides = [1, 1, 1]} : vector<4x16x32xf32> to vector<1x16x32xf32>
    %40 = vector.shape_cast %39 : vector<1x16x32xf32> to vector<16x32xf32>
    %41 = vector.extract_strided_slice %38 {offsets = [0, 0, 0], sizes = [1, 16, 1], strides = [1, 1, 1]} : vector<4x16x1xf32> to vector<1x16x1xf32>
    %42 = vector.shape_cast %41 : vector<1x16x1xf32> to vector<16x1xf32>
    %43 = vector.broadcast %42 : vector<16x1xf32> to vector<16x32xf32>
    %44 = arith.mulf %40, %43 : vector<16x32xf32>
    %45 = vector.extract_strided_slice %37 {offsets = [1, 0, 0], sizes = [1, 16, 32], strides = [1, 1, 1]} : vector<4x16x32xf32> to vector<1x16x32xf32>
    %46 = vector.shape_cast %45 : vector<1x16x32xf32> to vector<16x32xf32>
    %47 = vector.extract_strided_slice %38 {offsets = [1, 0, 0], sizes = [1, 16, 1], strides = [1, 1, 1]} : vector<4x16x1xf32> to vector<1x16x1xf32>
    %48 = vector.shape_cast %47 : vector<1x16x1xf32> to vector<16x1xf32>
    %49 = vector.broadcast %48 : vector<16x1xf32> to vector<16x32xf32>
    %50 = arith.mulf %46, %49 : vector<16x32xf32>
    %51 = arith.addf %44, %50 : vector<16x32xf32>
    %52 = vector.extract_strided_slice %37 {offsets = [2, 0, 0], sizes = [1, 16, 32], strides = [1, 1, 1]} : vector<4x16x32xf32> to vector<1x16x32xf32>
    %53 = vector.shape_cast %52 : vector<1x16x32xf32> to vector<16x32xf32>
    %54 = vector.extract_strided_slice %38 {offsets = [2, 0, 0], sizes = [1, 16, 1], strides = [1, 1, 1]} : vector<4x16x1xf32> to vector<1x16x1xf32>
    %55 = vector.shape_cast %54 : vector<1x16x1xf32> to vector<16x1xf32>
    %56 = vector.broadcast %55 : vector<16x1xf32> to vector<16x32xf32>
    %57 = arith.mulf %53, %56 : vector<16x32xf32>
    %58 = arith.addf %51, %57 : vector<16x32xf32>
    %59 = vector.extract_strided_slice %37 {offsets = [3, 0, 0], sizes = [1, 16, 32], strides = [1, 1, 1]} : vector<4x16x32xf32> to vector<1x16x32xf32>
    %60 = vector.shape_cast %59 : vector<1x16x32xf32> to vector<16x32xf32>
    %61 = vector.extract_strided_slice %38 {offsets = [3, 0, 0], sizes = [1, 16, 1], strides = [1, 1, 1]} : vector<4x16x1xf32> to vector<1x16x1xf32>
    %62 = vector.shape_cast %61 : vector<1x16x1xf32> to vector<16x1xf32>
    %63 = vector.broadcast %62 : vector<16x1xf32> to vector<16x32xf32>
    %64 = arith.mulf %60, %63 : vector<16x32xf32>
    %65 = arith.addf %58, %64 : vector<16x32xf32>
    %66 = arith.addf %0, %65 : vector<16x32xf32>
    %c0_32 = arith.constant 0 : index
    %c0_33 = arith.constant 0 : index
    %67 = vector.load %arg14[%c0_32, %c0_33] : memref<1x32xf32, #tpu.memory_space<vmem>>, vector<1x32xf32>
    %c0_34 = arith.constant 0 : index
    %c0_35 = arith.constant 0 : index
    %68 = vector.load %arg15[%c0_34, %c0_35] : memref<1x32xf32, #tpu.memory_space<vmem>>, vector<1x32xf32>
    %cst_36 = arith.constant dense<0.000000e+00> : vector<16xf32>
    %69 = vector.multi_reduction <add>, %66, %cst_36 [1] : vector<16x32xf32> to vector<16xf32>
    %70 = vector.shape_cast %69 : vector<16xf32> to vector<16x1xf32>
    %cst_37 = arith.constant 3.200000e+01 : f32
    %71 = vector.broadcast %cst_37 : f32 to vector<16x1xf32>
    %72 = arith.divf %70, %71 : vector<16x1xf32>
    %73 = vector.broadcast %72 : vector<16x1xf32> to vector<16x32xf32>
    %74 = arith.subf %66, %73 : vector<16x32xf32>
    %75 = arith.mulf %74, %74 : vector<16x32xf32>
    %cst_38 = arith.constant dense<0.000000e+00> : vector<16xf32>
    %76 = vector.multi_reduction <add>, %75, %cst_38 [1] : vector<16x32xf32> to vector<16xf32>
    %77 = vector.shape_cast %76 : vector<16xf32> to vector<16x1xf32>
    %cst_39 = arith.constant 0.0322580636 : f32
    %78 = vector.broadcast %cst_39 : f32 to vector<16x1xf32>
    %79 = arith.mulf %77, %78 : vector<16x1xf32>
    %80 = vector.broadcast %67 : vector<1x32xf32> to vector<16x32xf32>
    %81 = arith.mulf %80, %74 : vector<16x32xf32>
    %cst_40 = arith.constant 9.99999997E-7 : f32
    %82 = vector.broadcast %cst_40 : f32 to vector<16x1xf32>
    %83 = arith.addf %79, %82 : vector<16x1xf32>
    %84 = math.rsqrt %83 : vector<16x1xf32>
    %85 = vector.broadcast %84 : vector<16x1xf32> to vector<16x32xf32>
    %86 = arith.mulf %81, %85 : vector<16x32xf32>
    %87 = vector.broadcast %68 : vector<1x32xf32> to vector<16x32xf32>
    %88 = arith.addf %86, %87 : vector<16x32xf32>
    %89 = arith.truncf %88 : vector<16x32xf32> to vector<16x32xbf16>
    %c0_41 = arith.constant 0 : index
    %c0_42 = arith.constant 0 : index
    %90 = vector.load %arg16[%c0_41, %c0_42] : memref<32x128xbf16, #tpu.memory_space<vmem>>, vector<32x128xbf16>
    %cst_43 = arith.constant dense<0.000000e+00> : vector<16x128xf32>
    %91 = tpu.matmul %89, %90, %cst_43 {dimension_numbers = #tpu.dot_dimension_numbers<[1], [0], [0], [1], [0, 0, 1, 1], [], []>} : vector<16x32xbf16>, vector<32x128xbf16>, vector<16x128xf32> -> vector<16x128xf32>
    %c0_44 = arith.constant 0 : index
    %c0_45 = arith.constant 0 : index
    %92 = vector.load %arg17[%c0_44, %c0_45] : memref<1x128xf32, #tpu.memory_space<vmem>>, vector<1x128xf32>
    %93 = vector.broadcast %92 : vector<1x128xf32> to vector<16x128xf32>
    %94 = arith.addf %91, %93 : vector<16x128xf32>
    %cst_46 = arith.constant 0.000000e+00 : f32
    %95 = vector.broadcast %cst_46 : f32 to vector<16x128xf32>
    %96 = arith.maximumf %94, %95 : vector<16x128xf32>
    %97 = arith.truncf %96 : vector<16x128xf32> to vector<16x128xbf16>
    %c0_47 = arith.constant 0 : index
    %c0_48 = arith.constant 0 : index
    %98 = vector.load %arg18[%c0_47, %c0_48] : memref<128x32xbf16, #tpu.memory_space<vmem>>, vector<128x32xbf16>
    %cst_49 = arith.constant dense<0.000000e+00> : vector<16x32xf32>
    %99 = tpu.matmul %97, %98, %cst_49 {dimension_numbers = #tpu.dot_dimension_numbers<[1], [0], [0], [1], [0, 0, 1, 1], [], []>} : vector<16x128xbf16>, vector<128x32xbf16>, vector<16x32xf32> -> vector<16x32xf32>
    %c0_50 = arith.constant 0 : index
    %c0_51 = arith.constant 0 : index
    %100 = vector.load %arg19[%c0_50, %c0_51] : memref<1x32xf32, #tpu.memory_space<vmem>>, vector<1x32xf32>
    %101 = vector.broadcast %100 : vector<1x32xf32> to vector<16x32xf32>
    %102 = arith.addf %99, %101 : vector<16x32xf32>
    %103 = arith.addf %88, %102 : vector<16x32xf32>
    %c0_52 = arith.constant 0 : index
    %c0_53 = arith.constant 0 : index
    %104 = vector.load %arg20[%c0_52, %c0_53] : memref<1x32xf32, #tpu.memory_space<vmem>>, vector<1x32xf32>
    %c0_54 = arith.constant 0 : index
    %c0_55 = arith.constant 0 : index
    %105 = vector.load %arg21[%c0_54, %c0_55] : memref<1x32xf32, #tpu.memory_space<vmem>>, vector<1x32xf32>
    %cst_56 = arith.constant dense<0.000000e+00> : vector<16xf32>
    %106 = vector.multi_reduction <add>, %103, %cst_56 [1] : vector<16x32xf32> to vector<16xf32>
    %107 = vector.shape_cast %106 : vector<16xf32> to vector<16x1xf32>
    %cst_57 = arith.constant 3.200000e+01 : f32
    %108 = vector.broadcast %cst_57 : f32 to vector<16x1xf32>
    %109 = arith.divf %107, %108 : vector<16x1xf32>
    %110 = vector.broadcast %109 : vector<16x1xf32> to vector<16x32xf32>
    %111 = arith.subf %103, %110 : vector<16x32xf32>
    %112 = arith.mulf %111, %111 : vector<16x32xf32>
    %cst_58 = arith.constant dense<0.000000e+00> : vector<16xf32>
    %113 = vector.multi_reduction <add>, %112, %cst_58 [1] : vector<16x32xf32> to vector<16xf32>
    %114 = vector.shape_cast %113 : vector<16xf32> to vector<16x1xf32>
    %cst_59 = arith.constant 0.0322580636 : f32
    %115 = vector.broadcast %cst_59 : f32 to vector<16x1xf32>
    %116 = arith.mulf %114, %115 : vector<16x1xf32>
    %117 = vector.broadcast %104 : vector<1x32xf32> to vector<16x32xf32>
    %118 = arith.mulf %117, %111 : vector<16x32xf32>
    %cst_60 = arith.constant 9.99999997E-7 : f32
    %119 = vector.broadcast %cst_60 : f32 to vector<16x1xf32>
    %120 = arith.addf %116, %119 : vector<16x1xf32>
    %121 = math.rsqrt %120 : vector<16x1xf32>
    %122 = vector.broadcast %121 : vector<16x1xf32> to vector<16x32xf32>
    %123 = arith.mulf %118, %122 : vector<16x32xf32>
    %124 = vector.broadcast %105 : vector<1x32xf32> to vector<16x32xf32>
    %125 = arith.addf %123, %124 : vector<16x32xf32>
    %c0_61 = arith.constant 0 : index
    %c0_62 = arith.constant 0 : index
    %126 = vector.load %arg5[%c0_61, %c0_62] : memref<16x1xf32, #tpu.memory_space<vmem>>, vector<16x1xf32>
    %127 = vector.broadcast %126 : vector<16x1xf32> to vector<16x32xf32>
    %128 = arith.mulf %125, %127 : vector<16x32xf32>
    %c0_63 = arith.constant 0 : index
    %c0_64 = arith.constant 0 : index
    %129 = vector.load %arg22[%c0_63, %c0_64] : memref<16x32xf32, #tpu.memory_space<vmem>>, vector<16x32xf32>
    tpu.vector_store %arg22[%c0_63, %c0_64], %128 {strides = array<i32>} : memref<16x32xf32, #tpu.memory_space<vmem>>, vector<16x32xf32>,
    return
  }
  func.func @transform_0(%arg0: i32) -> (i32, i32) {
    %c0_i32 = arith.constant 0 : i32
    %c0_i32_0 = arith.constant 0 : i32
    return %arg0, %c0_i32 : i32, i32
  }
  func.func @transform_1(%arg0: i32) -> (i32, i32, i32) {
    %c0_i32 = arith.constant 0 : i32
    %c0_i32_0 = arith.constant 0 : i32
    %c0_i32_1 = arith.constant 0 : i32
    return %c0_i32, %arg0, %c0_i32_0 : i32, i32, i32
  }
  func.func @transform_2(%arg0: i32) -> (i32, i32, i32) {
    %c0_i32 = arith.constant 0 : i32
    %c0_i32_0 = arith.constant 0 : i32
    %c0_i32_1 = arith.constant 0 : i32
    return %c0_i32, %arg0, %c0_i32_0 : i32, i32, i32
  }
  func.func @transform_3(%arg0: i32) -> (i32, i32, i32) {
    %c0_i32 = arith.constant 0 : i32
    %c0_i32_0 = arith.constant 0 : i32
    %c0_i32_1 = arith.constant 0 : i32
    return %c0_i32, %arg0, %c0_i32_0 : i32, i32, i32
  }
  func.func @transform_4(%arg0: i32) -> (i32, i32) {
    %c0_i32 = arith.constant 0 : i32
    %c0_i32_0 = arith.constant 0 : i32
    return %arg0, %c0_i32 : i32, i32
  }
  func.func @transform_5(%arg0: i32) -> (i32, i32) {
    %c0_i32 = arith.constant 0 : i32
    %c0_i32_0 = arith.constant 0 : i32
    %c0_i32_1 = arith.constant 0 : i32
    return %c0_i32, %c0_i32_0 : i32, i32
  }
  func.func @transform_6(%arg0: i32) -> (i32, i32) {
    %c0_i32 = arith.constant 0 : i32
    %c0_i32_0 = arith.constant 0 : i32
    %c0_i32_1 = arith.constant 0 : i32
    return %c0_i32, %c0_i32_0 : i32, i32
  }
  func.func @transform_7(%arg0: i32) -> (i32, i32) {
    %c0_i32 = arith.constant 0 : i32
    %c0_i32_0 = arith.constant 0 : i32
    %c0_i32_1 = arith.constant 0 : i32
    return %c0_i32, %c0_i32_0 : i32, i32
  }
  func.func @transform_8(%arg0: i32) -> (i32, i32) {
    %c0_i32 = arith.constant 0 : i32
    %c0_i32_0 = arith.constant 0 : i32
    %c0_i32_1 = arith.constant 0 : i32
    return %c0_i32, %c0_i32_0 : i32, i32
  }
  func.func @transform_9(%arg0: i32) -> (i32, i32) {
    %c0_i32 = arith.constant 0 : i32
    %c0_i32_0 = arith.constant 0 : i32
    %c0_i32_1 = arith.constant 0 : i32
    return %c0_i32, %c0_i32_0 : i32, i32
  }
  func.func @transform_10(%arg0: i32) -> (i32, i32) {
    %c0_i32 = arith.constant 0 : i32
    %c0_i32_0 = arith.constant 0 : i32
    %c0_i32_1 = arith.constant 0 : i32
    return %c0_i32, %c0_i32_0 : i32, i32
  }
  func.func @transform_11(%arg0: i32) -> (i32, i32) {
    %c0_i32 = arith.constant 0 : i32
    %c0_i32_0 = arith.constant 0 : i32
    %c0_i32_1 = arith.constant 0 : i32
    return %c0_i32, %c0_i32_0 : i32, i32
  }
  func.func @transform_12(%arg0: i32) -> (i32, i32) {
    %c0_i32 = arith.constant 0 : i32
    %c0_i32_0 = arith.constant 0 : i32
    %c0_i32_1 = arith.constant 0 : i32
    return %c0_i32, %c0_i32_0 : i32, i32
  }
  func.func @transform_13(%arg0: i32) -> (i32, i32) {
    %c0_i32 = arith.constant 0 : i32
    %c0_i32_0 = arith.constant 0 : i32
    %c0_i32_1 = arith.constant 0 : i32
    return %c0_i32, %c0_i32_0 : i32, i32
  }
  func.func @transform_14(%arg0: i32) -> (i32, i32) {
    %c0_i32 = arith.constant 0 : i32
    %c0_i32_0 = arith.constant 0 : i32
    %c0_i32_1 = arith.constant 0 : i32
    return %c0_i32, %c0_i32_0 : i32, i32
  }
  func.func @transform_15(%arg0: i32) -> (i32, i32) {
    %c0_i32 = arith.constant 0 : i32
    %c0_i32_0 = arith.constant 0 : i32
    %c0_i32_1 = arith.constant 0 : i32
    return %c0_i32, %c0_i32_0 : i32, i32
  }
  func.func @transform_16(%arg0: i32) -> (i32, i32) {
    %c0_i32 = arith.constant 0 : i32
    %c0_i32_0 = arith.constant 0 : i32
    %c0_i32_1 = arith.constant 0 : i32
    return %c0_i32, %c0_i32_0 : i32, i32
  }
  func.func @transform_17(%arg0: i32) -> (i32, i32) {
    %c0_i32 = arith.constant 0 : i32
    %c0_i32_0 = arith.constant 0 : i32
    %c0_i32_1 = arith.constant 0 : i32
    return %c0_i32, %c0_i32_0 : i32, i32
  }
  func.func @transform_18(%arg0: i32) -> (i32, i32) {
    %c0_i32 = arith.constant 0 : i32
    %c0_i32_0 = arith.constant 0 : i32
    %c0_i32_1 = arith.constant 0 : i32
    return %c0_i32, %c0_i32_0 : i32, i32
  }
  func.func @transform_19(%arg0: i32) -> (i32, i32) {
    %c0_i32 = arith.constant 0 : i32
    %c0_i32_0 = arith.constant 0 : i32
    %c0_i32_1 = arith.constant 0 : i32
    return %c0_i32, %c0_i32_0 : i32, i32
  }
  func.func @transform_20(%arg0: i32) -> (i32, i32) {
    %c0_i32 = arith.constant 0 : i32
    %c0_i32_0 = arith.constant 0 : i32
    %c0_i32_1 = arith.constant 0 : i32
    return %c0_i32, %c0_i32_0 : i32, i32
  }
  func.func @transform_21(%arg0: i32) -> (i32, i32) {
    %c0_i32 = arith.constant 0 : i32
    %c0_i32_0 = arith.constant 0 : i32
    return %arg0, %c0_i32 : i32, i32
  }
}

module attributes {stable_mosaic.version = 11 : i64} {
  func.func @_fused_mpnn_kernel(%arg0: i32, %arg1: memref<16x32xf32, #tpu.memory_space<vmem>>, %arg2: memref<4x16x64xbf16, #tpu.memory_space<vmem>>, %arg3: memref<4x16x32xbf16, #tpu.memory_space<vmem>>, %arg4: memref<4x16x32xbf16, #tpu.memory_space<vmem>>, %arg5: memref<4x16x1xbf16, #tpu.memory_space<vmem>>, %arg6: memref<16x1xf32, #tpu.memory_space<vmem>>, %arg7: memref<32x32xbf16, #tpu.memory_space<vmem>>, %arg8: memref<64x32xbf16, #tpu.memory_space<vmem>>, %arg9: memref<32x32xbf16, #tpu.memory_space<vmem>>, %arg10: memref<1x32xf32, #tpu.memory_space<vmem>>, %arg11: memref<32x32xbf16, #tpu.memory_space<vmem>>, %arg12: memref<1x32xf32, #tpu.memory_space<vmem>>, %arg13: memref<32x32xbf16, #tpu.memory_space<vmem>>, %arg14: memref<1x32xf32, #tpu.memory_space<vmem>>, %arg15: memref<1x32xf32, #tpu.memory_space<vmem>>, %arg16: memref<1x32xf32, #tpu.memory_space<vmem>>, %arg17: memref<32x128xbf16, #tpu.memory_space<vmem>>, %arg18: memref<1x128xf32, #tpu.memory_space<vmem>>, %arg19: memref<128x32xbf16, #tpu.memory_space<vmem>>, %arg20: memref<1x32xf32, #tpu.memory_space<vmem>>, %arg21: memref<1x32xf32, #tpu.memory_space<vmem>>, %arg22: memref<1x32xf32, #tpu.memory_space<vmem>>, %arg23: memref<16x32xf32, #tpu.memory_space<vmem>>) attributes {dimension_semantics = [#tpu.dimension_semantics<parallel>], iteration_bounds = array<i64: 1>, scalar_prefetch = 0 : i64, scratch_operands = 0 : i64, tpu.core_type = #tpu.core_type<tc>, window_params = [{transform_indices = @transform_0, window_bounds = array<i64: 16, 32>}, {transform_indices = @transform_1, window_bounds = array<i64: 4, 16, 64>}, {transform_indices = @transform_2, window_bounds = array<i64: 4, 16, 32>}, {transform_indices = @transform_3, window_bounds = array<i64: 4, 16, 32>}, {transform_indices = @transform_4, window_bounds = array<i64: 4, 16, 1>}, {transform_indices = @transform_5, window_bounds = array<i64: 16, 1>}, {pipeline_mode = #tpu.pipeline_mode<synchronous>, transform_indices = @transform_6, window_bounds = array<i64: 32, 32>}, {pipeline_mode = #tpu.pipeline_mode<synchronous>, transform_indices = @transform_7, window_bounds = array<i64: 64, 32>}, {pipeline_mode = #tpu.pipeline_mode<synchronous>, transform_indices = @transform_8, window_bounds = array<i64: 32, 32>}, {pipeline_mode = #tpu.pipeline_mode<synchronous>, transform_indices = @transform_9, window_bounds = array<i64: 1, 32>}, {pipeline_mode = #tpu.pipeline_mode<synchronous>, transform_indices = @transform_10, window_bounds = array<i64: 32, 32>}, {pipeline_mode = #tpu.pipeline_mode<synchronous>, transform_indices = @transform_11, window_bounds = array<i64: 1, 32>}, {pipeline_mode = #tpu.pipeline_mode<synchronous>, transform_indices = @transform_12, window_bounds = array<i64: 32, 32>}, {pipeline_mode = #tpu.pipeline_mode<synchronous>, transform_indices = @transform_13, window_bounds = array<i64: 1, 32>}, {pipeline_mode = #tpu.pipeline_mode<synchronous>, transform_indices = @transform_14, window_bounds = array<i64: 1, 32>}, {pipeline_mode = #tpu.pipeline_mode<synchronous>, transform_indices = @transform_15, window_bounds = array<i64: 1, 32>}, {pipeline_mode = #tpu.pipeline_mode<synchronous>, transform_indices = @transform_16, window_bounds = array<i64: 32, 128>}, {pipeline_mode = #tpu.pipeline_mode<synchronous>, transform_indices = @transform_17, window_bounds = array<i64: 1, 128>}, {pipeline_mode = #tpu.pipeline_mode<synchronous>, transform_indices = @transform_18, window_bounds = array<i64: 128, 32>}, {pipeline_mode = #tpu.pipeline_mode<synchronous>, transform_indices = @transform_19, window_bounds = array<i64: 1, 32>}, {pipeline_mode = #tpu.pipeline_mode<synchronous>, transform_indices = @transform_20, window_bounds = array<i64: 1, 32>}, {pipeline_mode = #tpu.pipeline_mode<synchronous>, transform_indices = @transform_21, window_bounds = array<i64: 1, 32>}, {transform_indices = @transform_22, window_bounds = array<i64: 16, 32>}]} {
    %c0 = arith.constant 0 : index
    %c0_0 = arith.constant 0 : index
    %0 = vector.load %arg1[%c0, %c0_0] : memref<16x32xf32, #tpu.memory_space<vmem>>, vector<16x32xf32>
    %1 = arith.truncf %0 : vector<16x32xf32> to vector<16x32xbf16>
    %c0_1 = arith.constant 0 : index
    %c0_2 = arith.constant 0 : index
    %2 = vector.load %arg7[%c0_1, %c0_2] : memref<32x32xbf16, #tpu.memory_space<vmem>>, vector<32x32xbf16>
    %cst = arith.constant dense<0.000000e+00> : vector<16x32xf32>
    %3 = tpu.matmul %1, %2, %cst {dimension_numbers = #tpu.dot_dimension_numbers<[1], [0], [0], [1], [0, 0, 1, 1], [], []>} : vector<16x32xbf16>, vector<32x32xbf16>, vector<16x32xf32> -> vector<16x32xf32>
    %c0_3 = arith.constant 0 : index
    %c0_4 = arith.constant 0 : index
    %4 = vector.load %arg10[%c0_3, %c0_4] : memref<1x32xf32, #tpu.memory_space<vmem>>, vector<1x32xf32>
    %5 = vector.broadcast %4 : vector<1x32xf32> to vector<16x32xf32>
    %6 = arith.addf %3, %5 : vector<16x32xf32>
    %c0_5 = arith.constant 0 : index
    %c0_6 = arith.constant 0 : index
    %c0_7 = arith.constant 0 : index
    %7 = vector.load %arg2[%c0_5, %c0_6, %c0_7] : memref<4x16x64xbf16, #tpu.memory_space<vmem>>, vector<4x16x64xbf16>
    %8 = vector.shape_cast %7 : vector<4x16x64xbf16> to vector<64x64xbf16>
    %c0_8 = arith.constant 0 : index
    %c0_9 = arith.constant 0 : index
    %c0_10 = arith.constant 0 : index
    %9 = vector.load %arg3[%c0_8, %c0_9, %c0_10] : memref<4x16x32xbf16, #tpu.memory_space<vmem>>, vector<4x16x32xbf16>
    %c0_11 = arith.constant 0 : index
    %c0_12 = arith.constant 0 : index
    %c0_13 = arith.constant 0 : index
    %10 = vector.load %arg5[%c0_11, %c0_12, %c0_13] : memref<4x16x1xbf16, #tpu.memory_space<vmem>>, vector<4x16x1xbf16>
    %11 = vector.broadcast %10 : vector<4x16x1xbf16> to vector<4x16x32xbf16>
    %12 = arith.mulf %9, %11 : vector<4x16x32xbf16>
    %c0_14 = arith.constant 0 : index
    %c0_15 = arith.constant 0 : index
    %c0_16 = arith.constant 0 : index
    %13 = vector.load %arg4[%c0_14, %c0_15, %c0_16] : memref<4x16x32xbf16, #tpu.memory_space<vmem>>, vector<4x16x32xbf16>
    %14 = arith.addf %12, %13 : vector<4x16x32xbf16>
    %15 = vector.shape_cast %14 : vector<4x16x32xbf16> to vector<64x32xbf16>
    %c0_17 = arith.constant 0 : index
    %c0_18 = arith.constant 0 : index
    %16 = vector.load %arg8[%c0_17, %c0_18] : memref<64x32xbf16, #tpu.memory_space<vmem>>, vector<64x32xbf16>
    %cst_19 = arith.constant dense<0.000000e+00> : vector<64x32xf32>
    %17 = tpu.matmul %8, %16, %cst_19 {dimension_numbers = #tpu.dot_dimension_numbers<[1], [0], [0], [1], [0, 0, 1, 1], [], []>} : vector<64x64xbf16>, vector<64x32xbf16>, vector<64x32xf32> -> vector<64x32xf32>
    %c0_20 = arith.constant 0 : index
    %c0_21 = arith.constant 0 : index
    %18 = vector.load %arg9[%c0_20, %c0_21] : memref<32x32xbf16, #tpu.memory_space<vmem>>, vector<32x32xbf16>
    %cst_22 = arith.constant dense<0.000000e+00> : vector<64x32xf32>
    %19 = tpu.matmul %15, %18, %cst_22 {dimension_numbers = #tpu.dot_dimension_numbers<[1], [0], [0], [1], [0, 0, 1, 1], [], []>} : vector<64x32xbf16>, vector<32x32xbf16>, vector<64x32xf32> -> vector<64x32xf32>
    %20 = arith.addf %17, %19 : vector<64x32xf32>
    %21 = vector.shape_cast %20 : vector<64x32xf32> to vector<4x16x32xf32>
    %22 = vector.shape_cast %6 : vector<16x32xf32> to vector<1x16x32xf32>
    %23 = vector.broadcast %22 : vector<1x16x32xf32> to vector<4x16x32xf32>
    %24 = arith.addf %21, %23 : vector<4x16x32xf32>
    %cst_23 = arith.constant 0.000000e+00 : f32
    %25 = vector.broadcast %cst_23 : f32 to vector<4x16x32xf32>
    %26 = arith.maximumf %24, %25 : vector<4x16x32xf32>
    %27 = vector.shape_cast %26 : vector<4x16x32xf32> to vector<64x32xf32>
    %28 = arith.truncf %27 : vector<64x32xf32> to vector<64x32xbf16>
    %c0_24 = arith.constant 0 : index
    %c0_25 = arith.constant 0 : index
    %29 = vector.load %arg11[%c0_24, %c0_25] : memref<32x32xbf16, #tpu.memory_space<vmem>>, vector<32x32xbf16>
    %cst_26 = arith.constant dense<0.000000e+00> : vector<64x32xf32>
    %30 = tpu.matmul %28, %29, %cst_26 {dimension_numbers = #tpu.dot_dimension_numbers<[1], [0], [0], [1], [0, 0, 1, 1], [], []>} : vector<64x32xbf16>, vector<32x32xbf16>, vector<64x32xf32> -> vector<64x32xf32>
    %c0_27 = arith.constant 0 : index
    %c0_28 = arith.constant 0 : index
    %31 = vector.load %arg12[%c0_27, %c0_28] : memref<1x32xf32, #tpu.memory_space<vmem>>, vector<1x32xf32>
    %32 = vector.broadcast %31 : vector<1x32xf32> to vector<64x32xf32>
    %33 = arith.addf %30, %32 : vector<64x32xf32>
    %cst_29 = arith.constant 0.000000e+00 : f32
    %34 = vector.broadcast %cst_29 : f32 to vector<64x32xf32>
    %35 = arith.maximumf %33, %34 : vector<64x32xf32>
    %36 = arith.truncf %35 : vector<64x32xf32> to vector<64x32xbf16>
    %c0_30 = arith.constant 0 : index
    %c0_31 = arith.constant 0 : index
    %37 = vector.load %arg13[%c0_30, %c0_31] : memref<32x32xbf16, #tpu.memory_space<vmem>>, vector<32x32xbf16>
    %cst_32 = arith.constant dense<0.000000e+00> : vector<64x32xf32>
    %38 = tpu.matmul %36, %37, %cst_32 {dimension_numbers = #tpu.dot_dimension_numbers<[1], [0], [0], [1], [0, 0, 1, 1], [], []>} : vector<64x32xbf16>, vector<32x32xbf16>, vector<64x32xf32> -> vector<64x32xf32>
    %c0_33 = arith.constant 0 : index
    %c0_34 = arith.constant 0 : index
    %39 = vector.load %arg14[%c0_33, %c0_34] : memref<1x32xf32, #tpu.memory_space<vmem>>, vector<1x32xf32>
    %40 = vector.broadcast %39 : vector<1x32xf32> to vector<64x32xf32>
    %41 = arith.addf %38, %40 : vector<64x32xf32>
    %42 = vector.shape_cast %41 : vector<64x32xf32> to vector<4x16x32xf32>
    %43 = vector.extract_strided_slice %42 {offsets = [0, 0, 0], sizes = [1, 16, 32], strides = [1, 1, 1]} : vector<4x16x32xf32> to vector<1x16x32xf32>
    %44 = vector.shape_cast %43 : vector<1x16x32xf32> to vector<16x32xf32>
    %45 = vector.extract_strided_slice %42 {offsets = [1, 0, 0], sizes = [1, 16, 32], strides = [1, 1, 1]} : vector<4x16x32xf32> to vector<1x16x32xf32>
    %46 = vector.shape_cast %45 : vector<1x16x32xf32> to vector<16x32xf32>
    %47 = arith.addf %44, %46 : vector<16x32xf32>
    %48 = vector.extract_strided_slice %42 {offsets = [2, 0, 0], sizes = [1, 16, 32], strides = [1, 1, 1]} : vector<4x16x32xf32> to vector<1x16x32xf32>
    %49 = vector.shape_cast %48 : vector<1x16x32xf32> to vector<16x32xf32>
    %50 = arith.addf %47, %49 : vector<16x32xf32>
    %51 = vector.extract_strided_slice %42 {offsets = [3, 0, 0], sizes = [1, 16, 32], strides = [1, 1, 1]} : vector<4x16x32xf32> to vector<1x16x32xf32>
    %52 = vector.shape_cast %51 : vector<1x16x32xf32> to vector<16x32xf32>
    %53 = arith.addf %50, %52 : vector<16x32xf32>
    %54 = arith.addf %0, %53 : vector<16x32xf32>
    %c0_35 = arith.constant 0 : index
    %c0_36 = arith.constant 0 : index
    %55 = vector.load %arg15[%c0_35, %c0_36] : memref<1x32xf32, #tpu.memory_space<vmem>>, vector<1x32xf32>
    %c0_37 = arith.constant 0 : index
    %c0_38 = arith.constant 0 : index
    %56 = vector.load %arg16[%c0_37, %c0_38] : memref<1x32xf32, #tpu.memory_space<vmem>>, vector<1x32xf32>
    %cst_39 = arith.constant dense<0.000000e+00> : vector<16xf32>
    %57 = vector.multi_reduction <add>, %54, %cst_39 [1] : vector<16x32xf32> to vector<16xf32>
    %58 = vector.shape_cast %57 : vector<16xf32> to vector<16x1xf32>
    %cst_40 = arith.constant 3.200000e+01 : f32
    %59 = vector.broadcast %cst_40 : f32 to vector<16x1xf32>
    %60 = arith.divf %58, %59 : vector<16x1xf32>
    %61 = vector.broadcast %60 : vector<16x1xf32> to vector<16x32xf32>
    %62 = arith.subf %54, %61 : vector<16x32xf32>
    %63 = arith.mulf %62, %62 : vector<16x32xf32>
    %cst_41 = arith.constant dense<0.000000e+00> : vector<16xf32>
    %64 = vector.multi_reduction <add>, %63, %cst_41 [1] : vector<16x32xf32> to vector<16xf32>
    %65 = vector.shape_cast %64 : vector<16xf32> to vector<16x1xf32>
    %cst_42 = arith.constant 0.0322580636 : f32
    %66 = vector.broadcast %cst_42 : f32 to vector<16x1xf32>
    %67 = arith.mulf %65, %66 : vector<16x1xf32>
    %68 = vector.broadcast %55 : vector<1x32xf32> to vector<16x32xf32>
    %69 = arith.mulf %68, %62 : vector<16x32xf32>
    %cst_43 = arith.constant 9.99999997E-7 : f32
    %70 = vector.broadcast %cst_43 : f32 to vector<16x1xf32>
    %71 = arith.addf %67, %70 : vector<16x1xf32>
    %72 = math.rsqrt %71 : vector<16x1xf32>
    %73 = vector.broadcast %72 : vector<16x1xf32> to vector<16x32xf32>
    %74 = arith.mulf %69, %73 : vector<16x32xf32>
    %75 = vector.broadcast %56 : vector<1x32xf32> to vector<16x32xf32>
    %76 = arith.addf %74, %75 : vector<16x32xf32>
    %77 = arith.truncf %76 : vector<16x32xf32> to vector<16x32xbf16>
    %c0_44 = arith.constant 0 : index
    %c0_45 = arith.constant 0 : index
    %78 = vector.load %arg17[%c0_44, %c0_45] : memref<32x128xbf16, #tpu.memory_space<vmem>>, vector<32x128xbf16>
    %cst_46 = arith.constant dense<0.000000e+00> : vector<16x128xf32>
    %79 = tpu.matmul %77, %78, %cst_46 {dimension_numbers = #tpu.dot_dimension_numbers<[1], [0], [0], [1], [0, 0, 1, 1], [], []>} : vector<16x32xbf16>, vector<32x128xbf16>, vector<16x128xf32> -> vector<16x128xf32>
    %c0_47 = arith.constant 0 : index
    %c0_48 = arith.constant 0 : index
    %80 = vector.load %arg18[%c0_47, %c0_48] : memref<1x128xf32, #tpu.memory_space<vmem>>, vector<1x128xf32>
    %81 = vector.broadcast %80 : vector<1x128xf32> to vector<16x128xf32>
    %82 = arith.addf %79, %81 : vector<16x128xf32>
    %cst_49 = arith.constant 0.000000e+00 : f32
    %83 = vector.broadcast %cst_49 : f32 to vector<16x128xf32>
    %84 = arith.maximumf %82, %83 : vector<16x128xf32>
    %85 = arith.truncf %84 : vector<16x128xf32> to vector<16x128xbf16>
    %c0_50 = arith.constant 0 : index
    %c0_51 = arith.constant 0 : index
    %86 = vector.load %arg19[%c0_50, %c0_51] : memref<128x32xbf16, #tpu.memory_space<vmem>>, vector<128x32xbf16>
    %cst_52 = arith.constant dense<0.000000e+00> : vector<16x32xf32>
    %87 = tpu.matmul %85, %86, %cst_52 {dimension_numbers = #tpu.dot_dimension_numbers<[1], [0], [0], [1], [0, 0, 1, 1], [], []>} : vector<16x128xbf16>, vector<128x32xbf16>, vector<16x32xf32> -> vector<16x32xf32>
    %c0_53 = arith.constant 0 : index
    %c0_54 = arith.constant 0 : index
    %88 = vector.load %arg20[%c0_53, %c0_54] : memref<1x32xf32, #tpu.memory_space<vmem>>, vector<1x32xf32>
    %89 = vector.broadcast %88 : vector<1x32xf32> to vector<16x32xf32>
    %90 = arith.addf %87, %89 : vector<16x32xf32>
    %91 = arith.addf %76, %90 : vector<16x32xf32>
    %c0_55 = arith.constant 0 : index
    %c0_56 = arith.constant 0 : index
    %92 = vector.load %arg21[%c0_55, %c0_56] : memref<1x32xf32, #tpu.memory_space<vmem>>, vector<1x32xf32>
    %c0_57 = arith.constant 0 : index
    %c0_58 = arith.constant 0 : index
    %93 = vector.load %arg22[%c0_57, %c0_58] : memref<1x32xf32, #tpu.memory_space<vmem>>, vector<1x32xf32>
    %cst_59 = arith.constant dense<0.000000e+00> : vector<16xf32>
    %94 = vector.multi_reduction <add>, %91, %cst_59 [1] : vector<16x32xf32> to vector<16xf32>
    %95 = vector.shape_cast %94 : vector<16xf32> to vector<16x1xf32>
    %cst_60 = arith.constant 3.200000e+01 : f32
    %96 = vector.broadcast %cst_60 : f32 to vector<16x1xf32>
    %97 = arith.divf %95, %96 : vector<16x1xf32>
    %98 = vector.broadcast %97 : vector<16x1xf32> to vector<16x32xf32>
    %99 = arith.subf %91, %98 : vector<16x32xf32>
    %100 = arith.mulf %99, %99 : vector<16x32xf32>
    %cst_61 = arith.constant dense<0.000000e+00> : vector<16xf32>
    %101 = vector.multi_reduction <add>, %100, %cst_61 [1] : vector<16x32xf32> to vector<16xf32>
    %102 = vector.shape_cast %101 : vector<16xf32> to vector<16x1xf32>
    %cst_62 = arith.constant 0.0322580636 : f32
    %103 = vector.broadcast %cst_62 : f32 to vector<16x1xf32>
    %104 = arith.mulf %102, %103 : vector<16x1xf32>
    %105 = vector.broadcast %92 : vector<1x32xf32> to vector<16x32xf32>
    %106 = arith.mulf %105, %99 : vector<16x32xf32>
    %cst_63 = arith.constant 9.99999997E-7 : f32
    %107 = vector.broadcast %cst_63 : f32 to vector<16x1xf32>
    %108 = arith.addf %104, %107 : vector<16x1xf32>
    %109 = math.rsqrt %108 : vector<16x1xf32>
    %110 = vector.broadcast %109 : vector<16x1xf32> to vector<16x32xf32>
    %111 = arith.mulf %106, %110 : vector<16x32xf32>
    %112 = vector.broadcast %93 : vector<1x32xf32> to vector<16x32xf32>
    %113 = arith.addf %111, %112 : vector<16x32xf32>
    %c0_64 = arith.constant 0 : index
    %c0_65 = arith.constant 0 : index
    %114 = vector.load %arg6[%c0_64, %c0_65] : memref<16x1xf32, #tpu.memory_space<vmem>>, vector<16x1xf32>
    %115 = vector.broadcast %114 : vector<16x1xf32> to vector<16x32xf32>
    %116 = arith.mulf %113, %115 : vector<16x32xf32>
    %c0_66 = arith.constant 0 : index
    %c0_67 = arith.constant 0 : index
    %117 = vector.load %arg23[%c0_66, %c0_67] : memref<16x32xf32, #tpu.memory_space<vmem>>, vector<16x32xf32>
    tpu.vector_store %arg23[%c0_66, %c0_67], %116 {strides = array<i32>} : memref<16x32xf32, #tpu.memory_space<vmem>>, vector<16x32xf32>,
    return
  }
  func.func @transform_0(%arg0: i32) -> (i32, i32) {
    %c0_i32 = arith.constant 0 : i32
    %c0_i32_0 = arith.constant 0 : i32
    return %arg0, %c0_i32 : i32, i32
  }
  func.func @transform_1(%arg0: i32) -> (i32, i32, i32) {
    %c0_i32 = arith.constant 0 : i32
    %c0_i32_0 = arith.constant 0 : i32
    %c0_i32_1 = arith.constant 0 : i32
    return %c0_i32, %arg0, %c0_i32_0 : i32, i32, i32
  }
  func.func @transform_2(%arg0: i32) -> (i32, i32, i32) {
    %c0_i32 = arith.constant 0 : i32
    %c0_i32_0 = arith.constant 0 : i32
    %c0_i32_1 = arith.constant 0 : i32
    return %c0_i32, %arg0, %c0_i32_0 : i32, i32, i32
  }
  func.func @transform_3(%arg0: i32) -> (i32, i32, i32) {
    %c0_i32 = arith.constant 0 : i32
    %c0_i32_0 = arith.constant 0 : i32
    %c0_i32_1 = arith.constant 0 : i32
    return %c0_i32, %arg0, %c0_i32_0 : i32, i32, i32
  }
  func.func @transform_4(%arg0: i32) -> (i32, i32, i32) {
    %c0_i32 = arith.constant 0 : i32
    %c0_i32_0 = arith.constant 0 : i32
    %c0_i32_1 = arith.constant 0 : i32
    return %c0_i32, %arg0, %c0_i32_0 : i32, i32, i32
  }
  func.func @transform_5(%arg0: i32) -> (i32, i32) {
    %c0_i32 = arith.constant 0 : i32
    %c0_i32_0 = arith.constant 0 : i32
    return %arg0, %c0_i32 : i32, i32
  }
  func.func @transform_6(%arg0: i32) -> (i32, i32) {
    %c0_i32 = arith.constant 0 : i32
    %c0_i32_0 = arith.constant 0 : i32
    %c0_i32_1 = arith.constant 0 : i32
    return %c0_i32, %c0_i32_0 : i32, i32
  }
  func.func @transform_7(%arg0: i32) -> (i32, i32) {
    %c0_i32 = arith.constant 0 : i32
    %c0_i32_0 = arith.constant 0 : i32
    %c0_i32_1 = arith.constant 0 : i32
    return %c0_i32, %c0_i32_0 : i32, i32
  }
  func.func @transform_8(%arg0: i32) -> (i32, i32) {
    %c0_i32 = arith.constant 0 : i32
    %c0_i32_0 = arith.constant 0 : i32
    %c0_i32_1 = arith.constant 0 : i32
    return %c0_i32, %c0_i32_0 : i32, i32
  }
  func.func @transform_9(%arg0: i32) -> (i32, i32) {
    %c0_i32 = arith.constant 0 : i32
    %c0_i32_0 = arith.constant 0 : i32
    %c0_i32_1 = arith.constant 0 : i32
    return %c0_i32, %c0_i32_0 : i32, i32
  }
  func.func @transform_10(%arg0: i32) -> (i32, i32) {
    %c0_i32 = arith.constant 0 : i32
    %c0_i32_0 = arith.constant 0 : i32
    %c0_i32_1 = arith.constant 0 : i32
    return %c0_i32, %c0_i32_0 : i32, i32
  }
  func.func @transform_11(%arg0: i32) -> (i32, i32) {
    %c0_i32 = arith.constant 0 : i32
    %c0_i32_0 = arith.constant 0 : i32
    %c0_i32_1 = arith.constant 0 : i32
    return %c0_i32, %c0_i32_0 : i32, i32
  }
  func.func @transform_12(%arg0: i32) -> (i32, i32) {
    %c0_i32 = arith.constant 0 : i32
    %c0_i32_0 = arith.constant 0 : i32
    %c0_i32_1 = arith.constant 0 : i32
    return %c0_i32, %c0_i32_0 : i32, i32
  }
  func.func @transform_13(%arg0: i32) -> (i32, i32) {
    %c0_i32 = arith.constant 0 : i32
    %c0_i32_0 = arith.constant 0 : i32
    %c0_i32_1 = arith.constant 0 : i32
    return %c0_i32, %c0_i32_0 : i32, i32
  }
  func.func @transform_14(%arg0: i32) -> (i32, i32) {
    %c0_i32 = arith.constant 0 : i32
    %c0_i32_0 = arith.constant 0 : i32
    %c0_i32_1 = arith.constant 0 : i32
    return %c0_i32, %c0_i32_0 : i32, i32
  }
  func.func @transform_15(%arg0: i32) -> (i32, i32) {
    %c0_i32 = arith.constant 0 : i32
    %c0_i32_0 = arith.constant 0 : i32
    %c0_i32_1 = arith.constant 0 : i32
    return %c0_i32, %c0_i32_0 : i32, i32
  }
  func.func @transform_16(%arg0: i32) -> (i32, i32) {
    %c0_i32 = arith.constant 0 : i32
    %c0_i32_0 = arith.constant 0 : i32
    %c0_i32_1 = arith.constant 0 : i32
    return %c0_i32, %c0_i32_0 : i32, i32
  }
  func.func @transform_17(%arg0: i32) -> (i32, i32) {
    %c0_i32 = arith.constant 0 : i32
    %c0_i32_0 = arith.constant 0 : i32
    %c0_i32_1 = arith.constant 0 : i32
    return %c0_i32, %c0_i32_0 : i32, i32
  }
  func.func @transform_18(%arg0: i32) -> (i32, i32) {
    %c0_i32 = arith.constant 0 : i32
    %c0_i32_0 = arith.constant 0 : i32
    %c0_i32_1 = arith.constant 0 : i32
    return %c0_i32, %c0_i32_0 : i32, i32
  }
  func.func @transform_19(%arg0: i32) -> (i32, i32) {
    %c0_i32 = arith.constant 0 : i32
    %c0_i32_0 = arith.constant 0 : i32
    %c0_i32_1 = arith.constant 0 : i32
    return %c0_i32, %c0_i32_0 : i32, i32
  }
  func.func @transform_20(%arg0: i32) -> (i32, i32) {
    %c0_i32 = arith.constant 0 : i32
    %c0_i32_0 = arith.constant 0 : i32
    %c0_i32_1 = arith.constant 0 : i32
    return %c0_i32, %c0_i32_0 : i32, i32
  }
  func.func @transform_21(%arg0: i32) -> (i32, i32) {
    %c0_i32 = arith.constant 0 : i32
    %c0_i32_0 = arith.constant 0 : i32
    %c0_i32_1 = arith.constant 0 : i32
    return %c0_i32, %c0_i32_0 : i32, i32
  }
  func.func @transform_22(%arg0: i32) -> (i32, i32) {
    %c0_i32 = arith.constant 0 : i32
    %c0_i32_0 = arith.constant 0 : i32
    return %arg0, %c0_i32 : i32, i32
  }
}

module attributes {stable_mosaic.version = 11 : i64} {
  func.func @_linear_kernel(%arg0: i32, %arg1: memref<16x32xbf16, #tpu.memory_space<vmem>>, %arg2: memref<32x128xbf16, #tpu.memory_space<vmem>>, %arg3: memref<1x128xf32, #tpu.memory_space<vmem>>, %arg4: memref<16x128xf32, #tpu.memory_space<vmem>>) attributes {dimension_semantics = [#tpu.dimension_semantics<parallel>], iteration_bounds = array<i64: 1>, scalar_prefetch = 0 : i64, scratch_operands = 0 : i64, tpu.core_type = #tpu.core_type<tc>, window_params = [{transform_indices = @transform_0, window_bounds = array<i64: 16, 32>}, {pipeline_mode = #tpu.pipeline_mode<synchronous>, transform_indices = @transform_1, window_bounds = array<i64: 32, 128>}, {pipeline_mode = #tpu.pipeline_mode<synchronous>, transform_indices = @transform_2, window_bounds = array<i64: 1, 128>}, {transform_indices = @transform_3, window_bounds = array<i64: 16, 128>}]} {
    %c0 = arith.constant 0 : index
    %c0_0 = arith.constant 0 : index
    %0 = vector.load %arg1[%c0, %c0_0] : memref<16x32xbf16, #tpu.memory_space<vmem>>, vector<16x32xbf16>
    %c0_1 = arith.constant 0 : index
    %c0_2 = arith.constant 0 : index
    %1 = vector.load %arg2[%c0_1, %c0_2] : memref<32x128xbf16, #tpu.memory_space<vmem>>, vector<32x128xbf16>
    %cst = arith.constant dense<0.000000e+00> : vector<16x128xf32>
    %2 = tpu.matmul %0, %1, %cst {dimension_numbers = #tpu.dot_dimension_numbers<[1], [0], [0], [1], [0, 0, 1, 1], [], []>} : vector<16x32xbf16>, vector<32x128xbf16>, vector<16x128xf32> -> vector<16x128xf32>
    %c0_3 = arith.constant 0 : index
    %c0_4 = arith.constant 0 : index
    %3 = vector.load %arg3[%c0_3, %c0_4] : memref<1x128xf32, #tpu.memory_space<vmem>>, vector<1x128xf32>
    %4 = vector.broadcast %3 : vector<1x128xf32> to vector<16x128xf32>
    %5 = arith.addf %2, %4 : vector<16x128xf32>
    %cst_5 = arith.constant dense<0xFF800000> : vector<16xf32>
    %6 = vector.multi_reduction <maximumf>, %5, %cst_5 [1] : vector<16x128xf32> to vector<16xf32>
    %7 = vector.shape_cast %6 : vector<16xf32> to vector<16x1xf32>
    %8 = vector.broadcast %7 : vector<16x1xf32> to vector<16x128xf32>
    %9 = arith.subf %5, %8 : vector<16x128xf32>
    %10 = math.exp %9 : vector<16x128xf32>
    %cst_6 = arith.constant dense<0.000000e+00> : vector<16xf32>
    %11 = vector.multi_reduction <add>, %10, %cst_6 [1] : vector<16x128xf32> to vector<16xf32>
    %12 = vector.shape_cast %11 : vector<16xf32> to vector<16x1xf32>
    %13 = math.log %12 : vector<16x1xf32>
    %14 = vector.broadcast %13 : vector<16x1xf32> to vector<16x128xf32>
    %15 = arith.subf %9, %14 : vector<16x128xf32>
    %c0_7 = arith.constant 0 : index
    %c0_8 = arith.constant 0 : index
    %16 = vector.load %arg4[%c0_7, %c0_8] : memref<16x128xf32, #tpu.memory_space<vmem>>, vector<16x128xf32>
    tpu.vector_store %arg4[%c0_7, %c0_8], %15 {strides = array<i32>} : memref<16x128xf32, #tpu.memory_space<vmem>>, vector<16x128xf32>,
    return
  }
  func.func @transform_0(%arg0: i32) -> (i32, i32) {
    %c0_i32 = arith.constant 0 : i32
    %c0_i32_0 = arith.constant 0 : i32
    return %arg0, %c0_i32 : i32, i32
  }
  func.func @transform_1(%arg0: i32) -> (i32, i32) {
    %c0_i32 = arith.constant 0 : i32
    %c0_i32_0 = arith.constant 0 : i32
    %c0_i32_1 = arith.constant 0 : i32
    return %c0_i32, %c0_i32_0 : i32, i32
  }
  func.func @transform_2(%arg0: i32) -> (i32, i32) {
    %c0_i32 = arith.constant 0 : i32
    %c0_i32_0 = arith.constant 0 : i32
    %c0_i32_1 = arith.constant 0 : i32
    return %c0_i32, %c0_i32_0 : i32, i32
  }
  func.func @transform_3(%arg0: i32) -> (i32, i32) {
    %c0_i32 = arith.constant 0 : i32
    %c0_i32_0 = arith.constant 0 : i32
    return %arg0, %c0_i32 : i32, i32
  }
}

</mosaic_0001>

<bundles_post_ra>
// kernel: struct2seq_forward.6
= control target key start
LH: loop header
LB: loop body
LE: loop exit
PB: predicated region body
PF: predicated region fallthrough
CT: control target
= control target key end

     0   :  { %vm34_vm0 = vcmask 130048   ;;  %vm52_vm1 = vcmask 261120   ;;  %s106_s1 = inlined_call_operand.vmem [shape: bf16[16,32], index: 1, kind: input, shape index: {}]   ;;  %s107_s0 = inlined_call_operand.vmem [shape: bf16[16,16], index: 0, kind: input, shape index: {}]   ;;  %s108_s2 = inlined_call_operand.vmem [shape: f32[1,32], index: 2, kind: input, shape index: {}]   ;;  %s109_s3 = inlined_call_operand.vmem [shape: f32[16,32], index: 3, kind: output, shape index: {}]  }
   0x1   :  { %v69_v0 = vld [vmem:[%s106_s1] sm:$0xff] }
   0x2   :  { %v68_v1 = vld [vmem:[%s107_s0] sm:$0xff]  ;;  %45 = vmatpush.bf16.msra.mxu0 %v69_v0 }
   0x3   :  { %v70_v2 = vld [vmem:[%s108_s2] ss:$0 sm:$0xff] }
   0x5   :  { %67 = vmatmul.msk.bf16.vlgmr.msra.gmra.mxu0 %vm34_vm0, %v68_v1 }
  0x82   :  { %v47_v3 = vpop.f32.mrf.mxu0 }
  0x83   :  { %v48_v4 = vadd.f32 %v70_v2, %v47_v3 }
  0x85   :  { %53 = vst.msk [vmem:[%s109_s3] sm:$0xff] %vm52_vm1, %v48_v4 }
  0x8a   :  { %v49_v5 = vpop.f32.mrf.mxu0 }
  0x8b   :  { %v50_v6 = vadd.f32 %v70_v2, %v49_v5 }
  0x8d   :  { %54 = vst.msk [vmem:[%s109_s3 + $0x8] sm:$0xff] %vm52_vm1, %v50_v6 }

// kernel: struct2seq_forward.5
= control target key start
LH: loop header
LB: loop body
LE: loop exit
PB: predicated region body
PF: predicated region fallthrough
CT: control target
= control target key end

     0   :  { %s354_s12 = smov 0   ;;  %s377_s0 = inlined_call_operand.vmem [shape: bf16[64,16], index: 0, kind: input, shape index: {}]   ;;  %s378_s1 = inlined_call_operand.vmem [shape: bf16[16,32], index: 1, kind: input, shape index: {}]   ;;  %s379_s2 = inlined_call_operand.vmem [shape: f32[1,32], index: 2, kind: input, shape index: {}]   ;;  %s380_s3 = inlined_call_operand.vmem [shape: f32[64,32], index: 3, kind: output, shape index: {}]  }
   0x1 LB: > { %s288_s13 = sadd.s32 4294967295, %s332_s12   ;;  %p292_p0 = scmp.ge.s32.totalorder %s332_s12, 1  ;;  %s332_s12 = sphi %s354_s12, %s13_s12  }
   0x2   : > { %p138_p1 = scmp.lt.s32.totalorder %s332_s12, 3 }
   0x4   : > { %p139_p2 = pnand %p292_p0, %p138_p1 }
   0x5   : > { %s293_s16 = sshll.u32 (!%p139_p2), %s288_s13, 2 }
   0x6   : > { %142 = sbr.rel (%p139_p2) target bundleno = 153 (0x99), region = 32  ;;  %p163_p3 = scmp.lt.s32.totalorder (!%p139_p2), %s293_s16, 7 }
   0xb   : > { %v315_v0 = vld [vmem:[%s378_s1] sm:$0xff]  ;;  %s382_s16 = smov (!%p163_p3, %s293_s16), 7  ;;  %vm201_vm0 = vcmask 130048   ;;  %vm227_vm1 = vcmask 261120  }
   0xc   : > { %215 = vmatpush.bf16.msra.mxu0 %v315_v0  ;;  %316 = vmatpush.bf16.msra.mxu1 %v315_v0  ;;  %s294_s17 = sshll.u32 %s382_s16, 2  ;;  %s296_s21 = sshll.u32 %s382_s16, 3  ;;  %v325_v3 = vld [vmem:[%s379_s2] ss:$0 sm:$0xff] }
   0xd   : > { %s166_s20 = scalar_lea.vmem %s377_s0, %s294_s17  ;;  %s172_s26 = scalar_lea.vmem %s380_s3, %s296_s21 }
   0xe   : > { %v313_v1 = vld [vmem:[%s166_s20] sm:$0xff]  ;;  %v314_v2 = vld [vmem:[%s166_s20 + $0x8] sm:$0xff] }
   0xf   : > { %309 = vmatmul.msk.bf16.vlgmr.msra.gmra.mxu0 %vm201_vm0, %v313_v1  ;;  %310 = vmatmul.msk.bf16.vlgmr.msra.gmra.mxu1 %vm201_vm0, %v314_v2 }
  0x8c   : > { %v217_v4 = vpop.f32.mrf.mxu0  ;;  %v222_v5 = vpop.f32.mrf.mxu1 }
  0x8d   : > { %v218_v6 = vadd.f32 %v325_v3, %v217_v4  ;;  %v223_v10 = vadd.f32 %v325_v3, %v222_v5 }
  0x8f   : > { %228 = vst.msk [vmem:[%s172_s26] sm:$0xff] %vm227_vm1, %v218_v6 }
  0x90   : > { %230 = vst.msk [vmem:[%s172_s26 + $0x10] sm:$0xff] %vm227_vm1, %v223_v10 }
  0x94   : > { %v219_v7 = vpop.f32.mrf.mxu0  ;;  %v224_v8 = vpop.f32.mrf.mxu1 }
  0x95   : > { %v220_v9 = vadd.f32 %v325_v3, %v219_v7  ;;  %v225_v11 = vadd.f32 %v325_v3, %v224_v8 }
  0x97   : > { %229 = vst.msk [vmem:[%s172_s26 + $0x8] sm:$0xff] %vm227_vm1, %v220_v9 }
  0x98   : > { %231 = vst.msk [vmem:[%s172_s26 + $0x18] sm:$0xff] %vm227_vm1, %v225_v11 }
  0x99 PF: > { %s13_s12 = sadd.s32 1, %s332_s12  }
  0x9a   : > { %p10_p4 = scmp.ge.s32.totalorder %s13_s12, 4  }
  0x9c   :  { %12 = sbr.rel (!%p10_p4) target bundleno = 1 (0x1), region = 62 }

// kernel: struct2seq_forward.7
= control target key start
LH: loop header
LB: loop body
LE: loop exit
PB: predicated region body
PF: predicated region fallthrough
CT: control target
= control target key end

     0   :  { %vm92_vm0 = vcmask 261120   ;;  %s1251_s5 = inlined_call_operand.vmem [shape: bf16[32,32], index: 5, kind: input, shape index: {}]   ;;  %s1252_s7 = inlined_call_operand.vmem [shape: bf16[32,32], index: 7, kind: input, shape index: {}]   ;;  %s1253_s6 = inlined_call_operand.vmem [shape: bf16[32,32], index: 6, kind: input, shape index: {}]   ;;  %s1254_s0 = inlined_call_operand.vmem [shape: f32[16,32], index: 0, kind: input, shape index: {}]   ;;  %s1255_s2 = inlined_call_operand.vmem [shape: bf16[4,16,32], index: 2, kind: input, shape index: {}]   ;;  %s1256_s1 = inlined_call_operand.vmem [shape: bf16[4,16,32], index: 1, kind: input, shape index: {}]   ;;  %s1257_s8 = inlined_call_operand.vmem [shape: f32[1,32], index: 8, kind: input, shape index: {}]   ;;  %s1258_s10 = inlined_call_operand.vmem [shape: f32[1,32], index: 10, kind: input, shape index: {}]   ;;  %s1259_s9 = inlined_call_operand.vmem [shape: bf16[32,32], index: 9, kind: input, shape index: {}]   ;;  %s1260_s11 = inlined_call_operand.vmem [shape: bf16[32,32], index: 11, kind: input, shape index: {}]   ;;  %s1261_s12 = inlined_call_operand.vmem [shape: f32[1,32], index: 12, kind: input, shape index: {}]   ;;  %s1262_s3 = inlined_call_operand.vmem [shape: f32[4,16,1], index: 3, kind: input, shape index: {}]   ;;  %s1263_s13 = inlined_call_operand.vmem [shape: f32[1,32], index: 13, kind: input, shape index: {}]   ;;  %s1264_s15 = inlined_call_operand.vmem [shape: bf16[32,128], index: 15, kind: input, shape index: {}]   ;;  %s1265_s14 = inlined_call_operand.vmem [shape: f32[1,32], index: 14, kind: input, shape index: {}]   ;;  %s1266_s16 = inlined_call_operand.vmem [shape: f32[1,128], index: 16, kind: input, shape index: {}]   ;;  %s1267_s17 = inlined_call_operand.vmem [shape: bf16[128,32], index: 17, kind: input, shape index: {}]   ;;  %s1268_s18 = inlined_call_operand.vmem [shape: f32[1,32], index: 18, kind: input, shape index: {}]   ;;  %s1269_s19 = inlined_call_operand.vmem [shape: f32[1,32], index: 19, kind: input, shape index: {}]   ;;  %s1270_s4 = inlined_call_operand.vmem [shape: f32[16,1], index: 4, kind: input, shape index: {}]   ;;  %s1271_s20 = inlined_call_operand.vmem [shape: f32[1,32], index: 20, kind: input, shape index: {}]   ;;  %s1272_s21 = inlined_call_operand.vmem [shape: f32[16,32], index: 21, kind: output, shape index: {}]  }
   0x1   :  { %1279 = sst [smem:[#allocation2_spill]] %s1251_s5  ;;  %v907_v17 = vld [vmem:[%s1259_s9 + $0x8] sm:$0xff]  ;;  %v906_v18 = vld [vmem:[%s1259_s9] sm:$0xff] }
   0x2   :  { %1280 = sst [smem:[#allocation3_spill]] %s1252_s7  ;;  %338 = vmatpush.bf16.msra.mxu3 %v907_v17  ;;  %v925_v22 = vld [vmem:[%s1257_s8] ss:$0 sm:$0xff]  ;;  %v909_v48 = vld [vmem:[%s1260_s11 + $0x8] sm:$0xff] }
   0x3   :  { %1281 = sst [smem:[#allocation4_spill]] %s1253_s6 }
   0x4   :  { %1282 = sst [smem:[#allocation5_spill]] %s1254_s0 }
   0x5   :  { %1283 = sst [smem:[#allocation6_spill]] %s1255_s2 }
   0x6   :  { %1284 = sst [smem:[#allocation7_spill]] %s1256_s1  ;;  %339 = vmatpush.bf16.msra.mxu3 %v906_v18  ;;  %v436_v18 = vld [vmem:[%s1262_s3 + $0x10] sm:$0xff] }
   0x7   :  { %1285 = sst [smem:[#allocation8_spill]] %s1266_s16 }
   0x8   :  { %s1286_s26 = sld [smem:[#allocation2_spill]] }
   0x9   :  { %s1287_s16 = sld [smem:[#allocation3_spill]] }
   0xa   :  { %s1288_s29 = sld [smem:[#allocation4_spill]] }
   0xb   :  { %s1289_s24 = sld [smem:[#allocation5_spill]] }
   0xc   :  { %s1290_s28 = sld [smem:[#allocation6_spill]] }
   0xd   :  { %s1291_s30 = sld [smem:[#allocation7_spill]] }
   0xe   :  { %v893_v0 = vld [vmem:[%s1286_s26 + $0x8] sm:$0xff]  ;;  %v892_v3 = vld [vmem:[%s1286_s26] sm:$0xff]  ;;  %s1292_s7 = sld [smem:[#allocation8_spill]] }
   0xf   :  { %v905_v1 = vld [vmem:[%s1287_s16 + $0x8] sm:$0xff]  ;;  %102 = vmatpush.bf16.msra.mxu0 %v893_v0  ;;  %v904_v4 = vld [vmem:[%s1287_s16] sm:$0xff] }
  0x10   :  { %v903_v2 = vld [vmem:[%s1288_s29 + $0x8] sm:$0xff]  ;;  %184 = vmatpush.bf16.msra.mxu1 %v905_v1  ;;  %v902_v7 = vld [vmem:[%s1288_s29] sm:$0xff] }
  0x11   :  { %v1074_v5 = vld [vmem:[%s1289_s24] sm:$0xff]  ;;  %v1079_v6 = vld [vmem:[%s1289_s24 + $0x8] sm:$0xff]  ;;  %257 = vmatpush.bf16.msra.mxu2 %v903_v2 }
  0x12   :  { %v71_v8 = vpack.c.bf16 %v1079_v6, %v1074_v5  ;;  %v898_v9 = vld [vmem:[%s1290_s28] sm:$0xff]  ;;  %v899_v11 = vld [vmem:[%s1290_s28 + $0x8] sm:$0xff]  ;;  %v900_v13 = vld [vmem:[%s1290_s28 + $0x10] sm:$0xff] }
  0x13   :  { %103 = vmatpush.bf16.msra.mxu0 %v892_v3  ;;  %v894_v10 = vld [vmem:[%s1291_s30] sm:$0xff]  ;;  %v895_v12 = vld [vmem:[%s1291_s30 + $0x8] sm:$0xff]  ;;  %v896_v14 = vld [vmem:[%s1291_s30 + $0x10] sm:$0xff] }
  0x14   :  { %185 = vmatpush.bf16.msra.mxu1 %v904_v4  ;;  %v901_v15 = vld [vmem:[%s1290_s28 + $0x18] sm:$0xff] }
  0x15   :  { %258 = vmatpush.bf16.msra.mxu2 %v902_v7  ;;  %v897_v16 = vld [vmem:[%s1291_s30 + $0x18] sm:$0xff]  ;;  %v908_v7 = vld [vmem:[%s1260_s11] sm:$0xff] }
  0x16   :  { %770 = vmatmul.msk.bf16.vlgmr.msra.gmra.mxu0 %vm92_vm0, %v71_v8  ;;  %v944_v8 = vmov 0  }
  0x17   :  { %795 = vmatmul.msk.bf16.vlgmr.msra.gmra.mxu1 %vm92_vm0, %v898_v9  ;;  %411 = vmatpush.bf16.msrb.mxu0 %v909_v48  ;;  %v434_v9 = vld [vmem:[%s1262_s3] sm:$0xff] }
  0x18   :  { %823 = vmatmul.msk.bf16.vlgmr.msra.gmra.mxu2 %vm92_vm0, %v894_v10  ;;  %922 = vset.pattern.permute.xlu0 %v944_v8 }
  0x19   :  { %923 = vset.pattern.permute.xlu1 %v944_v8  ;;  %444 = vperm.xlu0 %922, %v434_v9  }
  0x1a   :  { %924 = vset.pattern.permute.xlu2 %v944_v8  ;;  %456 = vperm.xlu1 %923, %v436_v18  }
  0x1b   :  { %412 = vmatpush.bf16.msrb.mxu0 %v908_v7 }
  0x27   :  { %796 = vmatmul.msk.bf16.gmra.mxu1 %vm92_vm0, %v899_v11  ;;  %v926_v11 = vld [vmem:[%s1258_s10] ss:$0 sm:$0xff] }
  0x28   :  { %824 = vmatmul.msk.bf16.gmra.mxu2 %vm92_vm0, %v895_v12  ;;  %v435_v12 = vld [vmem:[%s1262_s3 + $0x8] sm:$0xff] }
  0x29   :  { %449 = vperm.xlu0 %922, %v435_v12  }
  0x37   :  { %797 = vmatmul.msk.bf16.gmra.mxu1 %vm92_vm0, %v900_v13 }
  0x38   :  { %825 = vmatmul.msk.bf16.gmra.mxu2 %vm92_vm0, %v896_v14 }
  0x47   :  { %798 = vmatmul.msk.bf16.gmra.mxu1 %vm92_vm0, %v901_v15 }
  0x48   :  { %826 = vmatmul.msk.bf16.gmra.mxu2 %vm92_vm0, %v897_v16 }
  0x93   :  { %v105_v20 = vpop.f32.mrf.mxu0 }
  0x94   :  { %v187_v19 = vpop.f32.mrf.mxu1  ;;  %v106_v24 = vadd.f32 %v925_v22, %v105_v20 }
  0x9b   :  { %v260_v21 = vpop.f32.mrf.mxu2  ;;  %v107_v26 = vpop.f32.mrf.mxu0 }
  0x9c   :  { %v189_v23 = vpop.f32.mrf.mxu1  ;;  %v261_v25 = vadd.f32 %v260_v21, %v187_v19  ;;  %v108_v29 = vadd.f32 %v925_v22, %v107_v26  ;;  %v437_v21 = vld [vmem:[%s1262_s3 + $0x18] sm:$0xff] }
  0x9d   :  { %461 = vperm.xlu1 %923, %v437_v21  }
  0x9e   :  { %v280_v28 = vadd.f32 %v261_v25, %v106_v24 }
  0xa0   :  { %v288_v33 = vmax.f32 %v280_v28, 0.0  ;;  %v441_v28 = vld [vmem:[%s1262_s3 + $0x38] sm:$0xff] }
  0xa3   :  { %v262_v27 = vpop.f32.mrf.mxu2 }
  0xa4   :  { %v263_v30 = vadd.f32 %v262_v27, %v189_v23  ;;  %v192_v31 = vpop.f32.mrf.mxu1 }
  0xa5   :  { %489 = vperm.xlu1 %923, %v441_v28  }
  0xa6   :  { %v281_v32 = vadd.f32 %v263_v30, %v108_v29  ;;  %v438_v30 = vld [vmem:[%s1262_s3 + $0x20] sm:$0xff] }
  0xa7   :  { %470 = vperm.xlu2 %924, %v438_v30  }
  0xa8   :  { %v289_v34 = vmax.f32 %v281_v32, 0.0  ;;  %v439_v32 = vld [vmem:[%s1262_s3 + $0x28] sm:$0xff] }
  0xaa   :  { %v296_v35 = vpack.c.bf16 %v289_v34, %v288_v33 }
  0xab   :  { %v265_v36 = vpop.f32.mrf.mxu2 }
  0xac   :  { %835 = vmatmul.msk.bf16.vlgmr.msra.gmra.mxu3 %vm92_vm0, %v296_v35  ;;  %v194_v37 = vpop.f32.mrf.mxu1  ;;  %v266_v38 = vadd.f32 %v265_v36, %v192_v31 }
  0xae   :  { %v282_v40 = vadd.f32 %v266_v38, %v106_v24 }
  0xaf   :  { %475 = vperm.xlu2 %924, %v439_v32  }
  0xb0   :  { %v290_v44 = vmax.f32 %v282_v40, 0.0 }
  0xb3   :  { %v267_v39 = vpop.f32.mrf.mxu2 }
  0xb4   :  { %v268_v41 = vadd.f32 %v267_v39, %v194_v37  ;;  %v197_v42 = vpop.f32.mrf.mxu1 }
  0xb6   :  { %v283_v43 = vadd.f32 %v268_v41, %v108_v29 }
  0xb8   :  { %v291_v45 = vmax.f32 %v283_v43, 0.0 }
  0xba   :  { %v297_v46 = vpack.c.bf16 %v291_v45, %v290_v44 }
  0xbb   :  { %v270_v47 = vpop.f32.mrf.mxu2 }
  0xbc   :  { %836 = vmatmul.msk.bf16.gmra.mxu3 %vm92_vm0, %v297_v46  ;;  %v199_v49 = vpop.f32.mrf.mxu1  ;;  %v271_v50 = vadd.f32 %v270_v47, %v197_v42 }
  0xbe   :  { %v284_v52 = vadd.f32 %v271_v50, %v106_v24  ;;  %v445_v50 = vpop.permute.xlu0 %444 }
  0xc0   :  { %v292_v55 = vmax.f32 %v284_v52, 0.0  ;;  %v927_v52 = vld [vmem:[%s1261_s12] ss:$0 sm:$0xff] }
  0xc3   :  { %v272_v51 = vpop.f32.mrf.mxu2 }
  0xc4   :  { %v273_v53 = vadd.f32 %v272_v51, %v199_v49  ;;  %v202_v57 = vpop.f32.mrf.mxu1 }
  0xc6   :  { %v285_v54 = vadd.f32 %v273_v53, %v108_v29  ;;  %v457_v53 = vpop.permute.xlu1 %456 }
  0xc8   :  { %v293_v56 = vmax.f32 %v285_v54, 0.0 }
  0xca   :  { %v298_v58 = vpack.c.bf16 %v293_v56, %v292_v55  ;;  %v450_v56 = vpop.permute.xlu0 %449 }
  0xcb   :  { %v275_v59 = vpop.f32.mrf.mxu2 }
  0xcc   :  { %837 = vmatmul.msk.bf16.gmra.mxu3 %vm92_vm0, %v298_v58  ;;  %v276_v60 = vadd.f32 %v275_v59, %v202_v57  ;;  %v204_v61 = vpop.f32.mrf.mxu1 }
  0xce   :  { %v286_v63 = vadd.f32 %v276_v60, %v106_v24 }
  0xd0   :  { %v294_v2 = vmax.f32 %v286_v63, 0.0 }
  0xd3   :  { %v277_v62 = vpop.f32.mrf.mxu2 }
  0xd4   :  { %v278_v0 = vadd.f32 %v277_v62, %v204_v61 }
  0xd6   :  { %v287_v1 = vadd.f32 %v278_v0, %v108_v29  ;;  %v440_v29 = vld [vmem:[%s1262_s3 + $0x30] sm:$0xff] }
  0xd7   :  { %484 = vperm.xlu0 %922, %v440_v29  }
  0xd8   :  { %v295_v3 = vmax.f32 %v287_v1, 0.0 }
  0xda   :  { %v299_v4 = vpack.c.bf16 %v295_v3, %v294_v2 }
  0xdc   :  { %838 = vmatmul.msk.bf16.gmra.mxu3 %vm92_vm0, %v299_v4 }
 0x101   :  { %v471_v57 = vpop.permute.xlu2 %470 }
 0x10f   :  { %v462_v3 = vpop.permute.xlu1 %461 }
 0x117   :  { %v490_v21 = vpop.permute.xlu1 %489 }
 0x12f   :  { %v341_v10 = vpop.f32.mrf.mxu3 }
 0x130   :  { %v342_v13 = vadd.f32 %v926_v11, %v341_v10 }
 0x132   :  { %v361_v16 = vmax.f32 %v342_v13, 0.0 }
 0x137   :  { %v343_v14 = vpop.f32.mrf.mxu3 }
 0x138   :  { %v344_v15 = vadd.f32 %v926_v11, %v343_v14 }
 0x13a   :  { %v362_v17 = vmax.f32 %v344_v15, 0.0 }
 0x13c   :  { %v369_v19 = vpack.c.bf16 %v362_v17, %v361_v16 }
 0x13e   :  { %847 = vmatmul.msk.bf16.vlgmr.msrb.gmra.mxu0 %vm92_vm0, %v369_v19 }
 0x13f   :  { %v346_v20 = vpop.f32.mrf.mxu3 }
 0x140   :  { %v347_v22 = vadd.f32 %v926_v11, %v346_v20 }
 0x142   :  { %v363_v25 = vmax.f32 %v347_v22, 0.0 }
 0x147   :  { %v348_v23 = vpop.f32.mrf.mxu3 }
 0x148   :  { %v349_v24 = vadd.f32 %v926_v11, %v348_v23 }
 0x149   :  { %v485_v4 = vpop.permute.xlu0 %484 }
 0x14a   :  { %v364_v26 = vmax.f32 %v349_v24, 0.0 }
 0x14c   :  { %v370_v27 = vpack.c.bf16 %v364_v26, %v363_v25 }
 0x14e   :  { %848 = vmatmul.msk.bf16.gmra.mxu0 %vm92_vm0, %v370_v27  ;;  %v945_v27 = vmov 32.0  }
 0x14f   :  { %v351_v31 = vpop.f32.mrf.mxu3  ;;  %934 = vrcp.f32 %v945_v27  ;;  %v931_v27 = vld [vmem:[%s1268_s18] ss:$0 sm:$0xff] }
 0x150   :  { %v352_v33 = vadd.f32 %v926_v11, %v351_v31 }
 0x152   :  { %v365_v36 = vmax.f32 %v352_v33, 0.0 }
 0x155   :  { %v935_v28 = vpop.eup %934 }
 0x156   :  { %v507_v29 = vmul.f32 32.0, %v935_v28  ;;  %vm511_vm1 = vweird.f32 %v935_v28 }
 0x157   :  { %v353_v34 = vpop.f32.mrf.mxu3 }
 0x158   :  { %v354_v35 = vadd.f32 %v926_v11, %v353_v34  ;;  %v508_v30 = vsub.f32 1.0, %v507_v29 }
 0x15a   :  { %v366_v37 = vmax.f32 %v354_v35, 0.0  ;;  %v509_v31 = vmul.f32 %v935_v28, %v508_v30 }
 0x15c   :  { %v371_v38 = vpack.c.bf16 %v366_v37, %v365_v36  ;;  %v510_v32 = vadd.f32 %v935_v28, %v509_v31 }
 0x15e   :  { %849 = vmatmul.msk.bf16.gmra.mxu0 %vm92_vm0, %v371_v38  ;;  %v1179_v33 = vsel %vm511_vm1, %v935_v28, %v510_v32 }
 0x15f   :  { %v356_v39 = vpop.f32.mrf.mxu3 }
 0x160   :  { %v357_v40 = vadd.f32 %v926_v11, %v356_v39 }
 0x162   :  { %v367_v43 = vmax.f32 %v357_v40, 0.0 }
 0x167   :  { %v358_v41 = vpop.f32.mrf.mxu3 }
 0x168   :  { %v359_v42 = vadd.f32 %v926_v11, %v358_v41  ;;  %v476_v11 = vpop.permute.xlu2 %475 }
 0x16a   :  { %v368_v44 = vmax.f32 %v359_v42, 0.0 }
 0x16c   :  { %v372_v45 = vpack.c.bf16 %v368_v44, %v367_v43  ;;  %v910_v43 = vld [vmem:[%s1264_s15] sm:$0xff] }
 0x16e   :  { %850 = vmatmul.msk.bf16.gmra.mxu0 %vm92_vm0, %v372_v45 }
 0x1bb   :  { %v414_v46 = vpop.f32.mrf.mxu0 }
 0x1bc   :  { %v415_v58 = vadd.f32 %v927_v52, %v414_v46 }
 0x1be   :  { %v452_v61 = vmul.f32 %v445_v50, %v415_v58 }
 0x1c3   :  { %v416_v47 = vpop.f32.mrf.mxu0 }
 0x1c4   :  { %v417_v7 = vadd.f32 %v927_v52, %v416_v47  ;;  %v919_v47 = vld [vmem:[%s1267_s17 + $0x38] sm:$0xff] }
 0x1c5   :  { %670 = vmatpush.bf16.msrb.mxu2 %v919_v47 }
 0x1c6   :  { %v453_v14 = vmul.f32 %v450_v56, %v417_v7  ;;  %v916_v56 = vld [vmem:[%s1267_s17 + $0x20] sm:$0xff] }
 0x1cb   :  { %v419_v48 = vpop.f32.mrf.mxu0 }
 0x1cc   :  { %v420_v55 = vadd.f32 %v927_v52, %v419_v48  ;;  %v918_v48 = vld [vmem:[%s1267_s17 + $0x30] sm:$0xff] }
 0x1cd   :  { %671 = vmatpush.bf16.msrb.mxu2 %v918_v48 }
 0x1ce   :  { %v464_v60 = vmul.f32 %v457_v53, %v420_v55  ;;  %v917_v53 = vld [vmem:[%s1267_s17 + $0x28] sm:$0xff] }
 0x1d0   :  { %v466_v0 = vadd.f32 %v464_v60, %v452_v61  ;;  %v915_v60 = vld [vmem:[%s1267_s17 + $0x18] sm:$0xff] }
 0x1d1   :  { %672 = vmatpush.bf16.msrb.mxu2 %v917_v53 }
 0x1d3   :  { %v421_v49 = vpop.f32.mrf.mxu0 }
 0x1d4   :  { %v422_v1 = vadd.f32 %v927_v52, %v421_v49 }
 0x1d5   :  { %673 = vmatpush.bf16.msrb.mxu2 %v916_v56  ;;  %v932_v56 = vld [vmem:[%s1269_s19] ss:$0 sm:$0xff] }
 0x1d6   :  { %v465_v12 = vmul.f32 %v462_v3, %v422_v1  ;;  %v914_v1 = vld [vmem:[%s1267_s17 + $0x10] sm:$0xff] }
 0x1d8   :  { %v467_v18 = vadd.f32 %v465_v12, %v453_v14  ;;  %v929_v12 = vld [vmem:[%s1265_s14] ss:$0 sm:$0xff] }
 0x1d9   :  { %674 = vmatpush.bf16.msrb.mxu2 %v915_v60 }
 0x1db   :  { %v424_v51 = vpop.f32.mrf.mxu0 }
 0x1dc   :  { %v425_v59 = vadd.f32 %v927_v52, %v424_v51 }
 0x1dd   :  { %675 = vmatpush.bf16.msrb.mxu2 %v914_v1 }
 0x1de   :  { %v478_v62 = vmul.f32 %v471_v57, %v425_v59 }
 0x1e0   :  { %v480_v8 = vadd.f32 %v478_v62, %v466_v0  ;;  %v928_v0 = vld [vmem:[%s1263_s13] ss:$0 sm:$0xff] }
 0x1e3   :  { %v426_v54 = vpop.f32.mrf.mxu0 }
 0x1e4   :  { %v427_v9 = vadd.f32 %v927_v52, %v426_v54 }
 0x1e6   :  { %v479_v15 = vmul.f32 %v476_v11, %v427_v9 }
 0x1e8   :  { %v481_v22 = vadd.f32 %v479_v15, %v467_v18  ;;  %v912_v18 = vld [vmem:[%s1267_s17] sm:$0xff] }
 0x1eb   :  { %v429_v63 = vpop.f32.mrf.mxu0 }
 0x1ec   :  { %v430_v2 = vadd.f32 %v927_v52, %v429_v63 }
 0x1ee   :  { %v492_v10 = vmul.f32 %v485_v4, %v430_v2 }
 0x1f0   :  { %v494_v13 = vadd.f32 %v492_v10, %v480_v8  ;;  %v913_v8 = vld [vmem:[%s1267_s17 + $0x8] sm:$0xff] }
 0x1f1   :  { %676 = vmatpush.bf16.msrb.mxu2 %v913_v8 }
 0x1f2   :  { %v496_v16 = vadd.f32 %v494_v13, %v1074_v5  ;;  %v911_v5 = vld [vmem:[%s1264_s15 + $0x8] sm:$0xff] }
 0x1f3   :  { %v431_v17 = vpop.f32.mrf.mxu0  ;;  %591 = vmatpush.bf16.msrb.mxu1 %v911_v5 }
 0x1f4   :  { %v432_v19 = vadd.f32 %v927_v52, %v431_v17  ;;  %v500_v20 = vsel %vm92_vm0, %v496_v16, 0.0 }
 0x1f5   :  { %501 = vadd.xlane.f32.xlu2 %v500_v20  ;;  %677 = vmatpush.bf16.msrb.mxu2 %v912_v18  ;;  %v930_v20 = vld [vmem:[%s1292_s7] ss:$0 sm:$0xff] }
 0x1f6   :  { %v493_v23 = vmul.f32 %v490_v21, %v432_v19 }
 0x1f7   :  { %592 = vmatpush.bf16.msrb.mxu1 %v910_v43 }
 0x1f8   :  { %v495_v24 = vadd.f32 %v493_v23, %v481_v22 }
 0x1fa   :  { %v497_v25 = vadd.f32 %v495_v24, %v1079_v6 }
 0x1fc   :  { %v503_v26 = vsel %vm92_vm0, %v497_v25, 0.0 }
 0x1fd   :  { %504 = vadd.xlane.f32.xlu0 %v503_v26 }
 0x268   :  { %v502_v34 = vpop.xlane.xlu2 %501 }
 0x269   :  { %v513_v6 = vmul.f32 %v1179_v33, %v502_v34 }
 0x26b   :  { %v515_v35 = vsub.f32 %v496_v16, %v513_v6 }
 0x26d   :  { %v517_v36 = vmul.f32 %v515_v35, %v515_v35  ;;  %v530_v7 = vmul.f32 %v928_v0, %v515_v35  ;;  %v742_v35 = vld [vmem:[%s1270_s4] sm:$0xff] }
 0x26f   :  { %v519_v37 = vsel %vm92_vm0, %v517_v36, 0.0 }
 0x270   :  { %v505_v38 = vpop.xlane.xlu0 %504  ;;  %520 = vadd.xlane.f32.xlu1 %v519_v37 }
 0x271   :  { %v514_v39 = vmul.f32 %v1179_v33, %v505_v38 }
 0x273   :  { %v516_v40 = vsub.f32 %v497_v25, %v514_v39 }
 0x275   :  { %v518_v41 = vmul.f32 %v516_v40, %v516_v40  ;;  %v531_v10 = vmul.f32 %v928_v0, %v516_v40 }
 0x277   :  { %v522_v42 = vsel %vm92_vm0, %v518_v41, 0.0 }
 0x278   :  { %523 = vadd.xlane.f32.xlu2 %v522_v42 }
 0x2e3   :  { %v521_v44 = vpop.xlane.xlu1 %520 }
 0x2e4   :  { %v525_v45 = vmul.f32 0.032258064, %v521_v44 }
 0x2e6   :  { %v532_v46 = vadd.f32 1e-06, %v525_v45 }
 0x2e8   :  { %936 = vrsqrt.f32 %v532_v46  ;;  %vm540_vm3 = vweird.f32 %v532_v46 }
 0x2eb   :  { %v524_v49 = vpop.xlane.xlu2 %523 }
 0x2ec   :  { %v526_v50 = vmul.f32 0.032258064, %v524_v49 }
 0x2ee   :  { %v937_v51 = vpop.eup %936  ;;  %v533_v52 = vadd.f32 1e-06, %v526_v50 }
 0x2ef   :  { %v535_v54 = vmul.f32 %v937_v51, %v532_v46  ;;  %vm541_vm2 = vweird.f32 %v937_v51  ;;  %v743_v46 = vld [vmem:[%s1270_s4 + $0x8] sm:$0xff] }
 0x2f0   :  { %938 = vrsqrt.f32 %v533_v52  ;;  %vm542_vm4 = vmor %vm540_vm3, %vm541_vm2  ;;  %vm550_vm6 = vweird.f32 %v533_v52 }
 0x2f1   :  { %v536_v55 = vmul.f32 %v937_v51, %v535_v54 }
 0x2f3   :  { %v537_v57 = vmul.f32 0.5, %v536_v55 }
 0x2f5   :  { %v538_v58 = vsub.f32 1.5, %v537_v57 }
 0x2f6   :  { %v939_v59 = vpop.eup %938 }
 0x2f7   :  { %v545_v61 = vmul.f32 %v939_v59, %v533_v52  ;;  %v539_v62 = vmul.f32 %v937_v51, %v538_v58  ;;  %vm551_vm5 = vweird.f32 %v939_v59 }
 0x2f8   :  { %vm552_vm7 = vmor %vm550_vm6, %vm551_vm5 }
 0x2f9   :  { %v546_v63 = vmul.f32 %v939_v59, %v545_v61  ;;  %v543_v3 = vsel %vm542_vm4, %v937_v51, %v539_v62  ;;  %v933_v62 = vld [vmem:[%s1271_s20] ss:$0 sm:$0xff] }
 0x2fa   :  { %v554_v11 = vmul.f32 %v543_v3, %v530_v7 }
 0x2fb   :  { %v547_v2 = vmul.f32 0.5, %v546_v63 }
 0x2fc   :  { %v559_v15 = vadd.f32 %v929_v12, %v554_v11 }
 0x2fd   :  { %v548_v4 = vsub.f32 1.5, %v547_v2 }
 0x2ff   :  { %v549_v9 = vmul.f32 %v939_v59, %v548_v4 }
 0x301   :  { %v553_v13 = vsel %vm552_vm7, %v939_v59, %v549_v9 }
 0x302   :  { %v555_v14 = vmul.f32 %v553_v13, %v531_v10 }
 0x304   :  { %v560_v16 = vadd.f32 %v929_v12, %v555_v14 }
 0x306   :  { %v561_v17 = vpack.c.bf16 %v560_v16, %v559_v15 }
 0x308   :  { %859 = vmatmul.msk.bf16.vlgmr.msrb.gmra.mxu1 %vm92_vm0, %v561_v17 }
 0x385   :  { %v594_v19 = vpop.f32.mrf.mxu1 }
 0x386   :  { %v595_v21 = vadd.f32 %v930_v20, %v594_v19 }
 0x388   :  { %v599_v24 = vmax.f32 %v595_v21, 0.0 }
 0x38d   :  { %v596_v22 = vpop.f32.mrf.mxu1 }
 0x38e   :  { %v597_v23 = vadd.f32 %v930_v20, %v596_v22 }
 0x390   :  { %v600_v25 = vmax.f32 %v597_v23, 0.0 }
 0x392   :  { %v601_v26 = vpack.c.bf16 %v600_v25, %v599_v24 }
 0x394   :  { %678 = vmatmul.bf16.vlgmr.msrb.gmra.mxu2 %v601_v26 }
 0x417   :  { %v679_v28 = vpop.f32.mrf.mxu2 }
 0x418   :  { %v680_v29 = vadd.f32 %v931_v27, %v679_v28 }
 0x41a   :  { %v684_v5 = vadd.f32 %v680_v29, %v559_v15 }
 0x41c   :  { %v688_v30 = vsel %vm92_vm0, %v684_v5, 0.0 }
 0x41d   :  { %689 = vadd.xlane.f32.xlu2 %v688_v30 }
 0x41f   :  { %v681_v31 = vpop.f32.mrf.mxu2 }
 0x420   :  { %v682_v32 = vadd.f32 %v931_v27, %v681_v31 }
 0x422   :  { %v685_v34 = vadd.f32 %v682_v32, %v560_v16 }
 0x424   :  { %v691_v6 = vsel %vm92_vm0, %v685_v34, 0.0 }
 0x425   :  { %692 = vadd.xlane.f32.xlu0 %v691_v6 }
 0x439   :  { %746 = vperm.xlu0 %922, %v742_v35  }
 0x490   :  { %v690_v36 = vpop.xlane.xlu2 %689 }
 0x491   :  { %v694_v37 = vmul.f32 %v690_v36, %v1179_v33 }
 0x493   :  { %v696_v38 = vsub.f32 %v684_v5, %v694_v37 }
 0x495   :  { %v698_v39 = vmul.f32 %v696_v38, %v696_v38  ;;  %v711_v61 = vmul.f32 %v932_v56, %v696_v38 }
 0x497   :  { %v700_v40 = vsel %vm92_vm0, %v698_v39, 0.0 }
 0x498   :  { %v693_v41 = vpop.xlane.xlu0 %692  ;;  %701 = vadd.xlane.f32.xlu1 %v700_v40 }
 0x499   :  { %v695_v42 = vmul.f32 %v693_v41, %v1179_v33 }
 0x49b   :  { %v697_v43 = vsub.f32 %v685_v34, %v695_v42 }
 0x49d   :  { %v699_v44 = vmul.f32 %v697_v43, %v697_v43  ;;  %v712_v10 = vmul.f32 %v932_v56, %v697_v43 }
 0x49f   :  { %v703_v45 = vsel %vm92_vm0, %v699_v44, 0.0 }
 0x4a0   :  { %704 = vadd.xlane.f32.xlu2 %v703_v45 }
 0x4ab   :  { %v747_v4 = vpop.permute.xlu0 %746 }
 0x4b1   :  { %751 = vperm.xlu1 %923, %v743_v46  }
 0x50b   :  { %v702_v47 = vpop.xlane.xlu1 %701 }
 0x50c   :  { %v706_v48 = vmul.f32 0.032258064, %v702_v47 }
 0x50e   :  { %v713_v49 = vadd.f32 1e-06, %v706_v48 }
 0x510   :  { %940 = vrsqrt.f32 %v713_v49  ;;  %vm721_vm9 = vweird.f32 %v713_v49 }
 0x513   :  { %v705_v50 = vpop.xlane.xlu2 %704 }
 0x514   :  { %v707_v51 = vmul.f32 0.032258064, %v705_v50 }
 0x516   :  { %v941_v52 = vpop.eup %940  ;;  %v714_v53 = vadd.f32 1e-06, %v707_v51 }
 0x517   :  { %v716_v54 = vmul.f32 %v941_v52, %v713_v49  ;;  %vm722_vm8 = vweird.f32 %v941_v52 }
 0x518   :  { %942 = vrsqrt.f32 %v714_v53  ;;  %vm723_vm10 = vmor %vm721_vm9, %vm722_vm8  ;;  %vm731_vm12 = vweird.f32 %v714_v53 }
 0x519   :  { %v717_v33 = vmul.f32 %v941_v52, %v716_v54 }
 0x51b   :  { %v718_v55 = vmul.f32 0.5, %v717_v33 }
 0x51d   :  { %v719_v57 = vsub.f32 1.5, %v718_v55 }
 0x51e   :  { %v943_v58 = vpop.eup %942 }
 0x51f   :  { %v720_v59 = vmul.f32 %v941_v52, %v719_v57  ;;  %v726_v60 = vmul.f32 %v943_v58, %v714_v53  ;;  %vm732_vm11 = vweird.f32 %v943_v58 }
 0x520   :  { %vm733_vm13 = vmor %vm731_vm12, %vm732_vm11 }
 0x521   :  { %v724_v63 = vsel %vm723_vm10, %v941_v52, %v720_v59  ;;  %v727_v0 = vmul.f32 %v943_v58, %v726_v60 }
 0x522   :  { %v735_v1 = vmul.f32 %v724_v63, %v711_v61 }
 0x523   :  { %v728_v2 = vmul.f32 0.5, %v727_v0  ;;  %v752_v14 = vpop.permute.xlu1 %751 }
 0x524   :  { %v740_v3 = vadd.f32 %v933_v62, %v735_v1 }
 0x525   :  { %v729_v7 = vsub.f32 1.5, %v728_v2 }
 0x526   :  { %v754_v8 = vmul.f32 %v747_v4, %v740_v3 }
 0x527   :  { %v730_v9 = vmul.f32 %v943_v58, %v729_v7 }
 0x528   :  { %756 = vst.msk [vmem:[%s1272_s21] sm:$0xff] %vm92_vm0, %v754_v8 }
 0x529   :  { %v734_v11 = vsel %vm733_vm13, %v943_v58, %v730_v9 }
 0x52a   :  { %v736_v12 = vmul.f32 %v734_v11, %v712_v10 }
 0x52c   :  { %v741_v13 = vadd.f32 %v933_v62, %v736_v12 }
 0x52e   :  { %v755_v15 = vmul.f32 %v752_v14, %v741_v13 }
 0x530   :  { %757 = vst.msk [vmem:[%s1272_s21 + $0x8] sm:$0xff] %vm92_vm0, %v755_v15 }

// kernel: struct2seq_forward.9
= control target key start
LH: loop header
LB: loop body
LE: loop exit
PB: predicated region body
PF: predicated region fallthrough
CT: control target
= control target key end

     0   :  { %vm42_vm0 = vcmask 261120   ;;  %s149_s1 = inlined_call_operand.vmem [shape: bf16[32,128], index: 1, kind: input, shape index: {}]   ;;  %s150_s2 = inlined_call_operand.vmem [shape: f32[1,128], index: 2, kind: input, shape index: {}]   ;;  %s151_s0 = inlined_call_operand.vmem [shape: bf16[16,32], index: 0, kind: input, shape index: {}]   ;;  %s152_s3 = inlined_call_operand.vmem [shape: f32[16,128], index: 3, kind: output, shape index: {}]  }
   0x1   :  { %v101_v0 = vld [vmem:[%s149_s1 + $0x8] sm:$0xff]  ;;  %v100_v1 = vld [vmem:[%s149_s1] sm:$0xff] }
   0x2   :  { %52 = vmatpush.bf16.msra.mxu0 %v101_v0  ;;  %v99_v2 = vld [vmem:[%s151_s0] sm:$0xff] }
   0x3   :  { %v102_v3 = vld [vmem:[%s150_s2] ss:$0 sm:$0xff] }
   0x6   :  { %53 = vmatpush.bf16.msra.mxu0 %v100_v1 }
   0x9   :  { %98 = vmatmul.msk.bf16.vlgmr.msra.gmra.mxu0 %vm42_vm0, %v99_v2 }
  0x86   :  { %v55_v4 = vpop.f32.mrf.mxu0 }
  0x87   :  { %v56_v5 = vadd.f32 %v102_v3, %v55_v4 }
  0x89   :  { %60 = vmax.xlane.f32.xlu0 %v56_v5 }
  0x8e   :  { %v57_v6 = vpop.f32.mrf.mxu0 }
  0x8f   :  { %v58_v7 = vadd.f32 %v102_v3, %v57_v6 }
  0x91   :  { %62 = vmax.xlane.f32.xlu0 %v58_v7 }
  0xfc   :  { %v61_v8 = vpop.xlane.xlu0 %60 }
  0xfd   :  { %v64_v9 = vsub.f32 %v56_v5, %v61_v8 }
  0xff   :  { %v66_v10 = vmul.f32 1.442695, %v64_v9 }
 0x101   :  { %103 = vpow2.f32 %v66_v10 }
 0x104   :  { %v63_v11 = vpop.xlane.xlu0 %62 }
 0x105   :  { %v65_v12 = vsub.f32 %v58_v7, %v63_v11 }
 0x107   :  { %v104_v13 = vpop.eup %103  ;;  %v68_v14 = vmul.f32 1.442695, %v65_v12 }
 0x108   :  { %70 = vadd.xlane.f32.xlu1 %v104_v13 }
 0x109   :  { %105 = vpow2.f32 %v68_v14 }
 0x10f   :  { %v106_v15 = vpop.eup %105 }
 0x110   :  { %72 = vadd.xlane.f32.xlu1 %v106_v15 }
 0x17b   :  { %v71_v16 = vpop.xlane.xlu1 %70 }
 0x17c   :  { %107 = vlog2.f32 %v71_v16 }
 0x182   :  { %v108_v17 = vpop.eup %107 }
 0x183   :  { %v75_v18 = vmul.f32 0.6931472, %v108_v17  ;;  %v73_v19 = vpop.xlane.xlu1 %72 }
 0x184   :  { %109 = vlog2.f32 %v73_v19 }
 0x185   :  { %v78_v20 = vsub.f32 %v64_v9, %v75_v18 }
 0x187   :  { %80 = vst [vmem:[%s152_s3] sm:$0xff] %v78_v20 }
 0x18a   :  { %v110_v21 = vpop.eup %109 }
 0x18b   :  { %v77_v22 = vmul.f32 0.6931472, %v110_v21 }
 0x18d   :  { %v79_v23 = vsub.f32 %v65_v12, %v77_v22 }
 0x18f   :  { %81 = vst [vmem:[%s152_s3 + $0x8] sm:$0xff] %v79_v23 }

// kernel: struct2seq_forward.8
= control target key start
LH: loop header
LB: loop body
LE: loop exit
PB: predicated region body
PF: predicated region fallthrough
CT: control target
= control target key end

     0   :  { %v1089_v0 = vmov 0   ;;  %vm410_vm0 = vcmask 523264   ;;  %vm95_vm1 = vcmask 261120   ;;  %v1090_v21 = vmov 839922192   ;;  %s1430_s4 = inlined_call_operand.vmem [shape: bf16[4,16,1], index: 4, kind: input, shape index: {}]   ;;  %s1431_s7 = inlined_call_operand.vmem [shape: bf16[64,32], index: 7, kind: input, shape index: {}]   ;;  %s1432_s9 = inlined_call_operand.vmem [shape: f32[1,32], index: 9, kind: input, shape index: {}]   ;;  %s1433_s6 = inlined_call_operand.vmem [shape: bf16[32,32], index: 6, kind: input, shape index: {}]   ;;  %s1434_s1 = inlined_call_operand.vmem [shape: bf16[4,16,64], index: 1, kind: input, shape index: {}]   ;;  %s1435_s0 = inlined_call_operand.vmem [shape: f32[16,32], index: 0, kind: input, shape index: {}]   ;;  %s1436_s8 = inlined_call_operand.vmem [shape: bf16[32,32], index: 8, kind: input, shape index: {}]   ;;  %s1437_s2 = inlined_call_operand.vmem [shape: bf16[4,16,32], index: 2, kind: input, shape index: {}]   ;;  %s1438_s3 = inlined_call_operand.vmem [shape: bf16[4,16,32], index: 3, kind: input, shape index: {}]   ;;  %s1439_s11 = inlined_call_operand.vmem [shape: f32[1,32], index: 11, kind: input, shape index: {}]   ;;  %s1440_s10 = inlined_call_operand.vmem [shape: bf16[32,32], index: 10, kind: input, shape index: {}]   ;;  %s1441_s12 = inlined_call_operand.vmem [shape: bf16[32,32], index: 12, kind: input, shape index: {}]   ;;  %s1442_s13 = inlined_call_operand.vmem [shape: f32[1,32], index: 13, kind: input, shape index: {}]   ;;  %s1443_s14 = inlined_call_operand.vmem [shape: f32[1,32], index: 14, kind: input, shape index: {}]   ;;  %s1444_s16 = inlined_call_operand.vmem [shape: bf16[32,128], index: 16, kind: input, shape index: {}]   ;;  %s1445_s15 = inlined_call_operand.vmem [shape: f32[1,32], index: 15, kind: input, shape index: {}]   ;;  %s1446_s17 = inlined_call_operand.vmem [shape: f32[1,128], index: 17, kind: input, shape index: {}]   ;;  %s1447_s18 = inlined_call_operand.vmem [shape: bf16[128,32], index: 18, kind: input, shape index: {}]   ;;  %s1448_s19 = inlined_call_operand.vmem [shape: f32[1,32], index: 19, kind: input, shape index: {}]   ;;  %s1449_s20 = inlined_call_operand.vmem [shape: f32[1,32], index: 20, kind: input, shape index: {}]   ;;  %s1450_s5 = inlined_call_operand.vmem [shape: f32[16,1], index: 5, kind: input, shape index: {}]   ;;  %s1451_s21 = inlined_call_operand.vmem [shape: f32[1,32], index: 21, kind: input, shape index: {}]   ;;  %s1452_s22 = inlined_call_operand.vmem [shape: f32[16,32], index: 22, kind: output, shape index: {}]  }
   0x1   :  { %1459 = sst [smem:[#allocation2_spill]] %s1430_s4  ;;  %1068 = vset.pattern.permute.xlu1 %v1089_v0  ;;  %1067 = vset.pattern.permute.xlu0 %v1089_v0  ;;  %v143_v22 = vunpack.c.l.s4 %v1090_v21  ;;  %v1027_v25 = vld [vmem:[%s1437_s2] sm:$0xff]   ;;  %v1058_v36 = vld [vmem:[%s1437_s2 + $0x8] sm:$0xff]  }
   0x2   :  { %1460 = sst [smem:[#allocation3_spill]] %s1431_s7  ;;  %1069 = vset.pattern.permute.xlu2 %v1089_v0  ;;  %v1028_v28 = vunpack.c.l.bf16 %v1027_v25  ;;  %v1043_v33 = vld [vmem:[%s1438_s3] sm:$0xff]   ;;  %v1029_v39 = vunpack.c.h.bf16 %v1027_v25  ;;  %v1032_v45 = vunpack.c.l.bf16 %v1058_v36  ;;  %v1033_v48 = vunpack.c.h.bf16 %v1058_v36  ;;  %v1061_v60 = vld [vmem:[%s1438_s3 + $0x8] sm:$0xff]   ;;  %v1062_v25 = vld [vmem:[%s1438_s3 + $0x10] sm:$0xff]  }
   0x3   :  { %1461 = sst [smem:[#allocation4_spill]] %s1432_s9  ;;  %v1275_v24 = vunpack.c.0.s8 %v143_v22  ;;  %v1044_v41 = vunpack.c.l.bf16 %v1043_v33  ;;  %v1045_v53 = vunpack.c.h.bf16 %v1043_v33  ;;  %v1053_v33 = vunpack.c.h.bf16 %v1062_v25 }
   0x4   :  { %1462 = sst [smem:[#allocation5_spill]] %s1433_s6 }
   0x5   :  { %1463 = sst [smem:[#allocation6_spill]] %s1434_s1 }
   0x6   :  { %1464 = sst [smem:[#allocation7_spill]] %s1435_s0 }
   0x7   :  { %1465 = sst [smem:[#allocation8_spill]] %s1436_s8 }
   0x8   :  { %s1466_s29 = sld [smem:[#allocation2_spill]] }
   0x9   :  { %s1467_s24 = sld [smem:[#allocation3_spill]] }
   0xa   :  { %s1469_s30 = sld [smem:[#allocation6_spill]] }
   0xb   :  { %s1470_s23 = sld [smem:[#allocation7_spill]] }
   0xc   :  { %s1471_s9 = sld [smem:[#allocation8_spill]] }
   0xe   :  { %v131_v1 = vld [vmem:[%s1466_s29 + $0x8] sm:$0xf]  ;;  %v129_v2 = vld [vmem:[%s1466_s29] sm:$0xf]  ;;  %v133_v3 = vld [vmem:[%s1466_s29 + $0x10] sm:$0xf] }
   0xf   :  { %157 = vperm.xlu1 %1068, %v131_v1   ;;  %139 = vperm.xlu0 %1067, %v129_v2   ;;  %v1009_v4 = vld [vmem:[%s1467_s24 + $0x18] sm:$0xff]  ;;  %v132_v5 = vld [vmem:[%s1466_s29 + $0xc] sm:$0xf]  ;;  %v130_v6 = vld [vmem:[%s1466_s29 + $0x4] sm:$0xf]  ;;  %v1048_v2 = vunpack.c.l.bf16 %v1061_v60 }
  0x10   :  { %175 = vperm.xlu2 %1069, %v133_v3   ;;  %427 = vmatpush.bf16.msra.mxu2 %v1009_v4  ;;  %v134_v7 = vld [vmem:[%s1466_s29 + $0x14] sm:$0xf]  ;;  %v136_v8 = vld [vmem:[%s1466_s29 + $0x1c] sm:$0xf]  ;;  %v135_v9 = vld [vmem:[%s1466_s29 + $0x18] sm:$0xf]  ;;  %v1049_v3 = vunpack.c.h.bf16 %v1061_v60 }
  0x11   :  { %v1008_v10 = vld [vmem:[%s1467_s24 + $0x10] sm:$0xff]  ;;  %v1007_v11 = vld [vmem:[%s1467_s24 + $0x8] sm:$0xff]  ;;  %v1006_v12 = vld [vmem:[%s1467_s24] sm:$0xff]  ;;  %s1468_s29 = sld [smem:[#allocation5_spill]] }
  0x12   :  { %v1002_v14 = vld [vmem:[%s1469_s30] sm:$0xff]  ;;  %v1261_v17 = vld [vmem:[%s1470_s23 + $0x8] sm:$0xff]  ;;  %v1004_v44 = vld [vmem:[%s1469_s30 + $0x10] sm:$0xff] }
  0x13   :  { %v1256_v16 = vld [vmem:[%s1470_s23] sm:$0xff]  ;;  %v1011_v19 = vld [vmem:[%s1471_s9 + $0x8] sm:$0xff] }
  0x14   :  { %428 = vmatpush.bf16.msra.mxu2 %v1008_v10  ;;  %v74_v18 = vpack.c.bf16 %v1261_v17, %v1256_v16  ;;  %343 = vmatpush.bf16.msra.mxu1 %v1011_v19  ;;  %v1010_v20 = vld [vmem:[%s1471_s9] sm:$0xff]  ;;  %v1003_v23 = vld [vmem:[%s1469_s30 + $0x8] sm:$0xff]  ;;  %v1005_v10 = vld [vmem:[%s1469_s30 + $0x18] sm:$0xff]  ;;  %s1472_s9 = sld [smem:[#allocation4_spill]] }
  0x17   :  { %166 = vperm.xlu1 %1068, %v132_v5   ;;  %148 = vperm.xlu0 %1067, %v130_v6   ;;  %v1001_v13 = vld [vmem:[%s1468_s29 + $0x8] sm:$0xff]  ;;  %v1000_v15 = vld [vmem:[%s1468_s29] sm:$0xff] }
  0x18   :  { %184 = vperm.xlu2 %1069, %v134_v7   ;;  %429 = vmatpush.bf16.msra.mxu2 %v1007_v11  ;;  %v1059_v7 = vld [vmem:[%s1437_s2 + $0x10] sm:$0xff]  }
  0x19   :  { %105 = vmatpush.bf16.msra.mxu0 %v1001_v13  ;;  %344 = vmatpush.bf16.msra.mxu1 %v1010_v20  ;;  %v1036_v11 = vunpack.c.l.bf16 %v1059_v7 }
  0x1c   :  { %430 = vmatpush.bf16.msra.mxu2 %v1006_v12 }
  0x1d   :  { %106 = vmatpush.bf16.msra.mxu0 %v1000_v15  ;;  %v1037_v15 = vunpack.c.h.bf16 %v1059_v7  ;;  %v1070_v7 = vld [vmem:[%s1472_s9] ss:$0 sm:$0xff] }
  0x1f   :  { %202 = vperm.xlu1 %1068, %v136_v8   ;;  %193 = vperm.xlu0 %1067, %v135_v9  }
  0x20   :  { %931 = vmatmul.msk.bf16.vlgmr.msra.gmra.mxu2 %vm410_vm0, %v1002_v14  ;;  %886 = vmatmul.msk.bf16.vlgmr.msra.gmra.mxu0 %vm95_vm1, %v74_v18 }
  0x30   :  { %932 = vmatmul.msk.bf16.gmra.mxu2 %vm410_vm0, %v1003_v23 }
  0x40   :  { %933 = vmatmul.msk.bf16.gmra.mxu2 %vm410_vm0, %v1004_v44 }
  0x50   :  { %934 = vmatmul.msk.bf16.gmra.mxu2 %vm410_vm0, %v1005_v10 }
  0x6a   :  { %v176_v46 = vpop.permute.xlu2 %175 }
  0x6b   :  { %v181_v4 = vperm.slane %v176_v46, %v1275_v24 }
  0x6d   :  { %v221_v12 = vunpack.c.l.bf16 %v181_v4 }
  0x6f   :  { %v229_v19 = vmul.f32 %v1036_v11, %v221_v12 }
  0x71   :  { %v237_v23 = vpack.c.bf16 %v229_v19, %v229_v19 }
  0x72   :  { %v185_v63 = vpop.permute.xlu2 %184 }
  0x73   :  { %v190_v9 = vperm.slane %v185_v63, %v1275_v24 }
  0x75   :  { %v222_v18 = vunpack.c.l.bf16 %v190_v9 }
  0x77   :  { %v230_v20 = vmul.f32 %v1037_v15, %v222_v18 }
  0x81   :  { %v158_v26 = vpop.permute.xlu1 %157  ;;  %v140_v27 = vpop.permute.xlu0 %139 }
  0x82   :  { %v145_v29 = vperm.slane %v140_v27, %v1275_v24  ;;  %v163_v37 = vperm.slane %v158_v26, %v1275_v24  ;;  %v238_v26 = vpack.c.bf16 %v230_v20, %v230_v20 }
  0x84   :  { %v217_v30 = vunpack.c.l.bf16 %v145_v29  ;;  %v219_v47 = vunpack.c.l.bf16 %v163_v37  ;;  %v254_v37 = vunpack.c.l.bf16 %v238_v26 }
  0x86   :  { %v225_v31 = vmul.f32 %v1028_v28, %v217_v30  ;;  %v227_v54 = vmul.f32 %v1032_v45, %v219_v47  ;;  %v270_v44 = vadd.f32 %v1053_v33, %v254_v37 }
  0x88   :  { %v233_v32 = vpack.c.bf16 %v225_v31, %v225_v31  ;;  %v235_v59 = vpack.c.bf16 %v227_v54, %v227_v54  ;;  %v1052_v31 = vunpack.c.l.bf16 %v1062_v25 }
  0x89   :  { %v167_v34 = vpop.permute.xlu1 %166  ;;  %v149_v35 = vpop.permute.xlu0 %148 }
  0x8a   :  { %v172_v38 = vperm.slane %v167_v34, %v1275_v24  ;;  %v154_v40 = vperm.slane %v149_v35, %v1275_v24  ;;  %v249_v42 = vunpack.c.l.bf16 %v233_v32  ;;  %v251_v5 = vunpack.c.l.bf16 %v235_v59  ;;  %v1060_v34 = vld [vmem:[%s1437_s2 + $0x18] sm:$0xff]  }
  0x8b   :  { %v253_v32 = vunpack.c.l.bf16 %v237_v23 }
  0x8c   :  { %v218_v43 = vunpack.c.l.bf16 %v154_v40  ;;  %v220_v49 = vunpack.c.l.bf16 %v172_v38  ;;  %v265_v51 = vadd.f32 %v1044_v41, %v249_v42  ;;  %v267_v13 = vadd.f32 %v1048_v2, %v251_v5  ;;  %v1012_v2 = vld [vmem:[%s1440_s10] sm:$0xff] }
  0x8d   :  { %v1040_v40 = vunpack.c.l.bf16 %v1060_v34 }
  0x8e   :  { %v226_v50 = vmul.f32 %v1029_v39, %v218_v43  ;;  %v228_v55 = vmul.f32 %v1033_v48, %v220_v49  ;;  %v273_v58 = vpack.c.bf16 %v265_v51, %v265_v51  ;;  %v275_v21 = vpack.c.bf16 %v267_v13, %v267_v13 }
  0x8f   :  { %v1041_v39 = vunpack.c.h.bf16 %v1060_v34  ;;  %v269_v43 = vadd.f32 %v1052_v31, %v253_v32  ;;  %v278_v48 = vpack.c.bf16 %v270_v44, %v270_v44 }
  0x90   :  { %v234_v52 = vpack.c.bf16 %v226_v50, %v226_v50  ;;  %v236_v61 = vpack.c.bf16 %v228_v55, %v228_v55  ;;  %v301_v0 = vunpack.c.l.b16 %v273_v58  ;;  %v303_v27 = vunpack.c.l.b16 %v275_v21  ;;  %v1063_v50 = vld [vmem:[%s1438_s3 + $0x18] sm:$0xff]  }
  0x91   :  { %v203_v29 = vpop.permute.xlu1 %202  ;;  %v194_v30 = vpop.permute.xlu0 %193  ;;  %v277_v47 = vpack.c.bf16 %v269_v43, %v269_v43  ;;  %v1056_v55 = vunpack.c.l.bf16 %v1063_v50 }
  0x92   :  { %v250_v56 = vunpack.c.l.bf16 %v234_v52  ;;  %v252_v6 = vunpack.c.l.bf16 %v236_v61  ;;  %v208_v35 = vperm.slane %v203_v29, %v1275_v24  ;;  %v199_v36 = vperm.slane %v194_v30, %v1275_v24 }
  0x93   :  { %v305_v51 = vunpack.c.l.b16 %v277_v47  ;;  %v306_v52 = vunpack.c.l.b16 %v278_v48 }
  0x94   :  { %v266_v57 = vadd.f32 %v1045_v53, %v250_v56  ;;  %v268_v14 = vadd.f32 %v1049_v3, %v252_v6  ;;  %v224_v41 = vunpack.c.l.bf16 %v208_v35  ;;  %v223_v42 = vunpack.c.l.bf16 %v199_v36  ;;  %v1015_v35 = vld [vmem:[%s1441_s12 + $0x8] sm:$0xff] }
  0x95   :  { %v1057_v53 = vunpack.c.h.bf16 %v1063_v50  ;;  %583 = vmatpush.bf16.msrb.mxu0 %v1015_v35 }
  0x96   :  { %v274_v62 = vpack.c.bf16 %v266_v57, %v266_v57  ;;  %v276_v22 = vpack.c.bf16 %v268_v14, %v268_v14  ;;  %v232_v45 = vmul.f32 %v1041_v39, %v224_v41  ;;  %v231_v46 = vmul.f32 %v1040_v40, %v223_v42 }
  0x97   :  { %v311_v57 = vpack.c.b16 %v306_v52, %v305_v51 }
  0x98   :  { %v302_v1 = vunpack.c.l.b16 %v274_v62  ;;  %v304_v28 = vunpack.c.l.b16 %v276_v22  ;;  %v240_v49 = vpack.c.bf16 %v232_v45, %v232_v45  ;;  %v239_v24 = vpack.c.bf16 %v231_v46, %v231_v46 }
  0x9a   :  { %v309_v8 = vpack.c.b16 %v302_v1, %v301_v0  ;;  %v310_v38 = vpack.c.b16 %v304_v28, %v303_v27  ;;  %v256_v54 = vunpack.c.l.bf16 %v240_v49  ;;  %v255_v56 = vunpack.c.l.bf16 %v239_v24  ;;  %v1013_v1 = vld [vmem:[%s1440_s10 + $0x8] sm:$0xff] }
  0x9b   :  { %510 = vmatpush.bf16.msra.mxu3 %v1013_v1 }
  0x9c   :  { %895 = vmatmul.msk.bf16.vlgmr.msra.gmra.mxu1 %vm95_vm1, %v309_v8  ;;  %v272_v58 = vadd.f32 %v1057_v53, %v256_v54  ;;  %v271_v59 = vadd.f32 %v1056_v55, %v255_v56  ;;  %v1014_v55 = vld [vmem:[%s1441_s12] sm:$0xff] }
  0x9d   :  { %v108_v4 = vpop.f32.mrf.mxu0  ;;  %584 = vmatpush.bf16.msrb.mxu0 %v1014_v55 }
  0x9e   :  { %v279_v60 = vpack.c.bf16 %v271_v59, %v271_v59  ;;  %v280_v61 = vpack.c.bf16 %v272_v58, %v272_v58  ;;  %v109_v8 = vadd.f32 %v1070_v7, %v108_v4 }
  0x9f   :  { %511 = vmatpush.bf16.msra.mxu3 %v1012_v2 }
  0xa0   :  { %v307_v62 = vunpack.c.l.b16 %v279_v60  ;;  %v308_v63 = vunpack.c.l.b16 %v280_v61 }
  0xa2   :  { %v312_v0 = vpack.c.b16 %v308_v63, %v307_v62 }
  0xa3   :  { %v432_v3 = vpop.f32.mrf.mxu2 }
  0xa5   :  { %v110_v10 = vpop.f32.mrf.mxu0 }
  0xa6   :  { %v111_v13 = vadd.f32 %v1070_v7, %v110_v10 }
  0xab   :  { %v434_v5 = vpop.f32.mrf.mxu2 }
  0xac   :  { %896 = vmatmul.msk.bf16.gmra.mxu1 %vm95_vm1, %v310_v38 }
  0xb3   :  { %v437_v11 = vpop.f32.mrf.mxu2 }
  0xbb   :  { %v439_v23 = vpop.f32.mrf.mxu2 }
  0xbc   :  { %897 = vmatmul.msk.bf16.gmra.mxu1 %vm95_vm1, %v311_v57  ;;  %v1071_v57 = vld [vmem:[%s1439_s11] ss:$0 sm:$0xff] }
  0xc3   :  { %v442_v29 = vpop.f32.mrf.mxu2 }
  0xcb   :  { %v444_v36 = vpop.f32.mrf.mxu2 }
  0xcc   :  { %898 = vmatmul.msk.bf16.gmra.mxu1 %vm95_vm1, %v312_v0 }
  0xd3   :  { %v447_v44 = vpop.f32.mrf.mxu2 }
  0xdb   :  { %v449_v48 = vpop.f32.mrf.mxu2 }
 0x119   :  { %v346_v6 = vpop.f32.mrf.mxu1 }
 0x11a   :  { %v433_v9 = vadd.f32 %v432_v3, %v346_v6 }
 0x11c   :  { %v452_v14 = vadd.f32 %v433_v9, %v109_v8 }
 0x11e   :  { %v460_v19 = vmax.f32 %v452_v14, 0.0 }
 0x121   :  { %v348_v12 = vpop.f32.mrf.mxu1 }
 0x122   :  { %v435_v15 = vadd.f32 %v434_v5, %v348_v12 }
 0x124   :  { %v453_v18 = vadd.f32 %v435_v15, %v111_v13 }
 0x126   :  { %v461_v20 = vmax.f32 %v453_v18, 0.0 }
 0x128   :  { %v468_v21 = vpack.c.bf16 %v461_v20, %v460_v19 }
 0x129   :  { %v351_v22 = vpop.f32.mrf.mxu1 }
 0x12a   :  { %943 = vmatmul.msk.bf16.vlgmr.msra.gmra.mxu3 %vm95_vm1, %v468_v21  ;;  %v438_v25 = vadd.f32 %v437_v11, %v351_v22 }
 0x12c   :  { %v454_v27 = vadd.f32 %v438_v25, %v109_v8 }
 0x12e   :  { %v462_v31 = vmax.f32 %v454_v27, 0.0 }
 0x131   :  { %v353_v26 = vpop.f32.mrf.mxu1 }
 0x132   :  { %v440_v28 = vadd.f32 %v439_v23, %v353_v26 }
 0x134   :  { %v455_v30 = vadd.f32 %v440_v28, %v111_v13 }
 0x136   :  { %v463_v32 = vmax.f32 %v455_v30, 0.0  ;;  %v1072_v30 = vld [vmem:[%s1442_s13] ss:$0 sm:$0xff] }
 0x138   :  { %v469_v33 = vpack.c.bf16 %v463_v32, %v462_v31 }
 0x139   :  { %v356_v34 = vpop.f32.mrf.mxu1 }
 0x13a   :  { %944 = vmatmul.msk.bf16.gmra.mxu3 %vm95_vm1, %v469_v33  ;;  %v443_v37 = vadd.f32 %v442_v29, %v356_v34 }
 0x13c   :  { %v456_v39 = vadd.f32 %v443_v37, %v109_v8 }
 0x13e   :  { %v464_v42 = vmax.f32 %v456_v39, 0.0 }
 0x141   :  { %v358_v38 = vpop.f32.mrf.mxu1 }
 0x142   :  { %v445_v40 = vadd.f32 %v444_v36, %v358_v38 }
 0x144   :  { %v457_v41 = vadd.f32 %v445_v40, %v111_v13 }
 0x146   :  { %v465_v43 = vmax.f32 %v457_v41, 0.0 }
 0x148   :  { %v470_v45 = vpack.c.bf16 %v465_v43, %v464_v42 }
 0x149   :  { %v361_v46 = vpop.f32.mrf.mxu1 }
 0x14a   :  { %945 = vmatmul.msk.bf16.gmra.mxu3 %vm95_vm1, %v470_v45  ;;  %v448_v47 = vadd.f32 %v447_v44, %v361_v46 }
 0x14c   :  { %v458_v50 = vadd.f32 %v448_v47, %v109_v8 }
 0x14e   :  { %v466_v52 = vmax.f32 %v458_v50, 0.0 }
 0x151   :  { %v363_v49 = vpop.f32.mrf.mxu1 }
 0x152   :  { %v450_v24 = vadd.f32 %v449_v48, %v363_v49 }
 0x154   :  { %v459_v51 = vadd.f32 %v450_v24, %v111_v13  ;;  %v1091_v24 = vmov 32.0  }
 0x155   :  { %1079 = vrcp.f32 %v1091_v24  ;;  %v1076_v24 = vld [vmem:[%s1448_s19] ss:$0 sm:$0xff] }
 0x156   :  { %v467_v53 = vmax.f32 %v459_v51, 0.0 }
 0x158   :  { %v471_v54 = vpack.c.bf16 %v467_v53, %v466_v52 }
 0x15a   :  { %946 = vmatmul.msk.bf16.gmra.mxu3 %vm95_vm1, %v471_v54 }
 0x15b   :  { %v1080_v51 = vpop.eup %1079 }
 0x15c   :  { %v623_v52 = vmul.f32 32.0, %v1080_v51  ;;  %vm627_vm2 = vweird.f32 %v1080_v51 }
 0x15e   :  { %v624_v53 = vsub.f32 1.0, %v623_v52 }
 0x160   :  { %v625_v54 = vmul.f32 %v1080_v51, %v624_v53 }
 0x162   :  { %v626_v55 = vadd.f32 %v1080_v51, %v625_v54 }
 0x1ad   :  { %v513_v56 = vpop.f32.mrf.mxu3 }
 0x1ae   :  { %v514_v58 = vadd.f32 %v1071_v57, %v513_v56  ;;  %v1358_v56 = vsel %vm627_vm2, %v1080_v51, %v626_v55 }
 0x1b0   :  { %v533_v61 = vmax.f32 %v514_v58, 0.0 }
 0x1b5   :  { %v515_v59 = vpop.f32.mrf.mxu3 }
 0x1b6   :  { %v516_v60 = vadd.f32 %v1071_v57, %v515_v59 }
 0x1b8   :  { %v534_v62 = vmax.f32 %v516_v60, 0.0 }
 0x1ba   :  { %v541_v63 = vpack.c.bf16 %v534_v62, %v533_v61 }
 0x1bc   :  { %955 = vmatmul.msk.bf16.vlgmr.msrb.gmra.mxu0 %vm95_vm1, %v541_v63 }
 0x1bd   :  { %v518_v0 = vpop.f32.mrf.mxu3 }
 0x1be   :  { %v519_v1 = vadd.f32 %v1071_v57, %v518_v0 }
 0x1c0   :  { %v535_v4 = vmax.f32 %v519_v1, 0.0 }
 0x1c5   :  { %v520_v2 = vpop.f32.mrf.mxu3 }
 0x1c6   :  { %v521_v3 = vadd.f32 %v1071_v57, %v520_v2  ;;  %v1016_v2 = vld [vmem:[%s1444_s16] sm:$0xff] }
 0x1c8   :  { %v536_v5 = vmax.f32 %v521_v3, 0.0 }
 0x1ca   :  { %v542_v6 = vpack.c.bf16 %v536_v5, %v535_v4 }
 0x1cc   :  { %956 = vmatmul.msk.bf16.gmra.mxu0 %vm95_vm1, %v542_v6  ;;  %v1025_v6 = vld [vmem:[%s1447_s18 + $0x38] sm:$0xff] }
 0x1cd   :  { %v523_v7 = vpop.f32.mrf.mxu3  ;;  %786 = vmatpush.bf16.msrb.mxu3 %v1025_v6 }
 0x1ce   :  { %v524_v8 = vadd.f32 %v1071_v57, %v523_v7  ;;  %v1024_v7 = vld [vmem:[%s1447_s18 + $0x30] sm:$0xff] }
 0x1d0   :  { %v537_v11 = vmax.f32 %v524_v8, 0.0 }
 0x1d1   :  { %787 = vmatpush.bf16.msrb.mxu3 %v1024_v7 }
 0x1d5   :  { %v525_v9 = vpop.f32.mrf.mxu3 }
 0x1d6   :  { %v526_v10 = vadd.f32 %v1071_v57, %v525_v9 }
 0x1d8   :  { %v538_v12 = vmax.f32 %v526_v10, 0.0 }
 0x1da   :  { %v543_v13 = vpack.c.bf16 %v538_v12, %v537_v11  ;;  %v1023_v12 = vld [vmem:[%s1447_s18 + $0x28] sm:$0xff] }
 0x1db   :  { %788 = vmatpush.bf16.msrb.mxu3 %v1023_v12 }
 0x1dc   :  { %957 = vmatmul.msk.bf16.gmra.mxu0 %vm95_vm1, %v543_v13 }
 0x1dd   :  { %v528_v14 = vpop.f32.mrf.mxu3 }
 0x1de   :  { %v529_v15 = vadd.f32 %v1071_v57, %v528_v14 }
 0x1e0   :  { %v539_v20 = vmax.f32 %v529_v15, 0.0  ;;  %v1022_v15 = vld [vmem:[%s1447_s18 + $0x20] sm:$0xff] }
 0x1e1   :  { %789 = vmatpush.bf16.msrb.mxu3 %v1022_v15  ;;  %v1077_v15 = vld [vmem:[%s1449_s20] ss:$0 sm:$0xff] }
 0x1e5   :  { %v530_v18 = vpop.f32.mrf.mxu3 }
 0x1e6   :  { %v531_v19 = vadd.f32 %v1071_v57, %v530_v18 }
 0x1e8   :  { %v540_v21 = vmax.f32 %v531_v19, 0.0 }
 0x1ea   :  { %v544_v22 = vpack.c.bf16 %v540_v21, %v539_v20  ;;  %v1021_v21 = vld [vmem:[%s1447_s18 + $0x18] sm:$0xff] }
 0x1eb   :  { %790 = vmatpush.bf16.msrb.mxu3 %v1021_v21 }
 0x1ec   :  { %958 = vmatmul.msk.bf16.gmra.mxu0 %vm95_vm1, %v544_v22 }
 0x239   :  { %v586_v23 = vpop.f32.mrf.mxu0 }
 0x23a   :  { %v587_v32 = vadd.f32 %v1072_v30, %v586_v23 }
 0x241   :  { %v588_v25 = vpop.f32.mrf.mxu0 }
 0x242   :  { %v589_v40 = vadd.f32 %v1072_v30, %v588_v25 }
 0x249   :  { %v591_v26 = vpop.f32.mrf.mxu0 }
 0x24a   :  { %v592_v31 = vadd.f32 %v1072_v30, %v591_v26  ;;  %v1073_v26 = vld [vmem:[%s1443_s14] ss:$0 sm:$0xff] }
 0x24c   :  { %v606_v34 = vadd.f32 %v592_v31, %v587_v32  ;;  %v1019_v32 = vld [vmem:[%s1447_s18 + $0x8] sm:$0xff] }
 0x251   :  { %v593_v27 = vpop.f32.mrf.mxu0 }
 0x252   :  { %v594_v38 = vadd.f32 %v1072_v30, %v593_v27  ;;  %v1020_v27 = vld [vmem:[%s1447_s18 + $0x10] sm:$0xff] }
 0x253   :  { %791 = vmatpush.bf16.msrb.mxu3 %v1020_v27 }
 0x254   :  { %v607_v43 = vadd.f32 %v594_v38, %v589_v40 }
 0x257   :  { %792 = vmatpush.bf16.msrb.mxu3 %v1019_v32 }
 0x259   :  { %v596_v28 = vpop.f32.mrf.mxu0 }
 0x25a   :  { %v597_v33 = vadd.f32 %v1072_v30, %v596_v28 }
 0x25c   :  { %v608_v36 = vadd.f32 %v606_v34, %v597_v33 }
 0x261   :  { %v598_v29 = vpop.f32.mrf.mxu0 }
 0x262   :  { %v599_v41 = vadd.f32 %v1072_v30, %v598_v29 }
 0x264   :  { %v609_v46 = vadd.f32 %v607_v43, %v599_v41 }
 0x269   :  { %v601_v35 = vpop.f32.mrf.mxu0 }
 0x26a   :  { %v602_v37 = vadd.f32 %v1072_v30, %v601_v35 }
 0x26c   :  { %v610_v39 = vadd.f32 %v608_v36, %v602_v37  ;;  %v1074_v36 = vld [vmem:[%s1445_s15] ss:$0 sm:$0xff] }
 0x26e   :  { %v612_v42 = vadd.f32 %v610_v39, %v1256_v16  ;;  %v1017_v16 = vld [vmem:[%s1444_s16 + $0x8] sm:$0xff] }
 0x26f   :  { %707 = vmatpush.bf16.msrb.mxu1 %v1017_v16 }
 0x270   :  { %v616_v44 = vsel %vm95_vm1, %v612_v42, 0.0 }
 0x271   :  { %v603_v45 = vpop.f32.mrf.mxu0  ;;  %617 = vadd.xlane.f32.xlu2 %v616_v44  ;;  %v1075_v44 = vld [vmem:[%s1446_s17] ss:$0 sm:$0xff] }
 0x272   :  { %v604_v47 = vadd.f32 %v1072_v30, %v603_v45 }
 0x273   :  { %708 = vmatpush.bf16.msrb.mxu1 %v1016_v2 }
 0x274   :  { %v611_v48 = vadd.f32 %v609_v46, %v604_v47 }
 0x276   :  { %v613_v49 = vadd.f32 %v611_v48, %v1261_v17 }
 0x278   :  { %v619_v50 = vsel %vm95_vm1, %v613_v49, 0.0 }
 0x279   :  { %620 = vadd.xlane.f32.xlu0 %v619_v50 }
 0x2e4   :  { %v618_v57 = vpop.xlane.xlu2 %617 }
 0x2e5   :  { %v629_v17 = vmul.f32 %v1358_v56, %v618_v57 }
 0x2e7   :  { %v631_v58 = vsub.f32 %v612_v42, %v629_v17  ;;  %v1018_v42 = vld [vmem:[%s1447_s18] sm:$0xff] }
 0x2e8   :  { %793 = vmatpush.bf16.msrb.mxu3 %v1018_v42 }
 0x2e9   :  { %v633_v59 = vmul.f32 %v631_v58, %v631_v58  ;;  %v646_v31 = vmul.f32 %v1073_v26, %v631_v58  ;;  %v858_v58 = vld [vmem:[%s1450_s5] sm:$0xff] }
 0x2eb   :  { %v635_v60 = vsel %vm95_vm1, %v633_v59, 0.0 }
 0x2ec   :  { %v621_v61 = vpop.xlane.xlu0 %620  ;;  %636 = vadd.xlane.f32.xlu1 %v635_v60 }
 0x2ed   :  { %v630_v62 = vmul.f32 %v1358_v56, %v621_v61 }
 0x2ef   :  { %v632_v63 = vsub.f32 %v613_v49, %v630_v62 }
 0x2f1   :  { %v634_v0 = vmul.f32 %v632_v63, %v632_v63  ;;  %v647_v34 = vmul.f32 %v1073_v26, %v632_v63 }
 0x2f3   :  { %v638_v1 = vsel %vm95_vm1, %v634_v0, 0.0 }
 0x2f4   :  { %639 = vadd.xlane.f32.xlu2 %v638_v1 }
 0x35f   :  { %v637_v3 = vpop.xlane.xlu1 %636 }
 0x360   :  { %v641_v4 = vmul.f32 0.032258064, %v637_v3 }
 0x362   :  { %v648_v5 = vadd.f32 1e-06, %v641_v4 }
 0x364   :  { %1081 = vrsqrt.f32 %v648_v5  ;;  %vm656_vm4 = vweird.f32 %v648_v5 }
 0x367   :  { %v640_v8 = vpop.xlane.xlu2 %639 }
 0x368   :  { %v642_v9 = vmul.f32 0.032258064, %v640_v8 }
 0x36a   :  { %v1082_v10 = vpop.eup %1081  ;;  %v649_v11 = vadd.f32 1e-06, %v642_v9 }
 0x36b   :  { %v651_v13 = vmul.f32 %v1082_v10, %v648_v5  ;;  %vm657_vm3 = vweird.f32 %v1082_v10  ;;  %v859_v5 = vld [vmem:[%s1450_s5 + $0x8] sm:$0xff] }
 0x36c   :  { %1083 = vrsqrt.f32 %v649_v11  ;;  %vm658_vm5 = vmor %vm656_vm4, %vm657_vm3  ;;  %vm666_vm7 = vweird.f32 %v649_v11 }
 0x36d   :  { %v652_v14 = vmul.f32 %v1082_v10, %v651_v13 }
 0x36f   :  { %v653_v18 = vmul.f32 0.5, %v652_v14 }
 0x371   :  { %v654_v19 = vsub.f32 1.5, %v653_v18 }
 0x372   :  { %v1084_v20 = vpop.eup %1083 }
 0x373   :  { %v661_v22 = vmul.f32 %v1084_v20, %v649_v11  ;;  %v655_v23 = vmul.f32 %v1082_v10, %v654_v19  ;;  %vm667_vm6 = vweird.f32 %v1084_v20 }
 0x374   :  { %vm668_vm8 = vmor %vm666_vm7, %vm667_vm6 }
 0x375   :  { %v662_v25 = vmul.f32 %v1084_v20, %v661_v22  ;;  %v659_v29 = vsel %vm658_vm5, %v1082_v10, %v655_v23  ;;  %v1078_v23 = vld [vmem:[%s1451_s21] ss:$0 sm:$0xff] }
 0x376   :  { %v670_v35 = vmul.f32 %v659_v29, %v646_v31 }
 0x377   :  { %v663_v28 = vmul.f32 0.5, %v662_v25 }
 0x378   :  { %v675_v39 = vadd.f32 %v1074_v36, %v670_v35 }
 0x379   :  { %v664_v30 = vsub.f32 1.5, %v663_v28 }
 0x37b   :  { %v665_v33 = vmul.f32 %v1084_v20, %v664_v30 }
 0x37d   :  { %v669_v37 = vsel %vm668_vm8, %v1084_v20, %v665_v33 }
 0x37e   :  { %v671_v38 = vmul.f32 %v669_v37, %v647_v34 }
 0x380   :  { %v676_v40 = vadd.f32 %v1074_v36, %v671_v38 }
 0x382   :  { %v677_v41 = vpack.c.bf16 %v676_v40, %v675_v39 }
 0x384   :  { %967 = vmatmul.msk.bf16.vlgmr.msrb.gmra.mxu1 %vm95_vm1, %v677_v41 }
 0x401   :  { %v710_v43 = vpop.f32.mrf.mxu1 }
 0x402   :  { %v711_v45 = vadd.f32 %v1075_v44, %v710_v43 }
 0x404   :  { %v715_v48 = vmax.f32 %v711_v45, 0.0 }
 0x409   :  { %v712_v46 = vpop.f32.mrf.mxu1 }
 0x40a   :  { %v713_v47 = vadd.f32 %v1075_v44, %v712_v46 }
 0x40c   :  { %v716_v49 = vmax.f32 %v713_v47, 0.0 }
 0x40e   :  { %v717_v50 = vpack.c.bf16 %v716_v49, %v715_v48 }
 0x410   :  { %794 = vmatmul.bf16.vlgmr.msrb.gmra.mxu3 %v717_v50 }
 0x493   :  { %v795_v51 = vpop.f32.mrf.mxu3 }
 0x494   :  { %v796_v52 = vadd.f32 %v1076_v24, %v795_v51 }
 0x496   :  { %v800_v16 = vadd.f32 %v796_v52, %v675_v39 }
 0x498   :  { %v804_v53 = vsel %vm95_vm1, %v800_v16, 0.0 }
 0x499   :  { %805 = vadd.xlane.f32.xlu2 %v804_v53 }
 0x49b   :  { %v797_v54 = vpop.f32.mrf.mxu3 }
 0x49c   :  { %v798_v55 = vadd.f32 %v1076_v24, %v797_v54 }
 0x49e   :  { %v801_v57 = vadd.f32 %v798_v55, %v676_v40 }
 0x4a0   :  { %v807_v17 = vsel %vm95_vm1, %v801_v57, 0.0 }
 0x4a1   :  { %808 = vadd.xlane.f32.xlu0 %v807_v17 }
 0x4b5   :  { %862 = vperm.xlu0 %1067, %v858_v58  }
 0x50c   :  { %v806_v59 = vpop.xlane.xlu2 %805 }
 0x50d   :  { %v810_v60 = vmul.f32 %v806_v59, %v1358_v56 }
 0x50f   :  { %v812_v61 = vsub.f32 %v800_v16, %v810_v60 }
 0x511   :  { %v814_v62 = vmul.f32 %v812_v61, %v812_v61  ;;  %v827_v22 = vmul.f32 %v1077_v15, %v812_v61 }
 0x513   :  { %v816_v63 = vsel %vm95_vm1, %v814_v62, 0.0 }
 0x514   :  { %v809_v0 = vpop.xlane.xlu0 %808  ;;  %817 = vadd.xlane.f32.xlu1 %v816_v63 }
 0x515   :  { %v811_v1 = vmul.f32 %v809_v0, %v1358_v56 }
 0x517   :  { %v813_v2 = vsub.f32 %v801_v57, %v811_v1 }
 0x519   :  { %v815_v3 = vmul.f32 %v813_v2, %v813_v2  ;;  %v828_v34 = vmul.f32 %v1077_v15, %v813_v2 }
 0x51b   :  { %v819_v4 = vsel %vm95_vm1, %v815_v3, 0.0 }
 0x51c   :  { %820 = vadd.xlane.f32.xlu2 %v819_v4 }
 0x527   :  { %v863_v30 = vpop.permute.xlu0 %862 }
 0x52d   :  { %867 = vperm.xlu1 %1068, %v859_v5  }
 0x587   :  { %v818_v6 = vpop.xlane.xlu1 %817 }
 0x588   :  { %v822_v7 = vmul.f32 0.032258064, %v818_v6 }
 0x58a   :  { %v829_v8 = vadd.f32 1e-06, %v822_v7 }
 0x58c   :  { %1085 = vrsqrt.f32 %v829_v8  ;;  %vm837_vm10 = vweird.f32 %v829_v8 }
 0x58f   :  { %v821_v9 = vpop.xlane.xlu2 %820 }
 0x590   :  { %v823_v10 = vmul.f32 0.032258064, %v821_v9 }
 0x592   :  { %v1086_v11 = vpop.eup %1085  ;;  %v830_v12 = vadd.f32 1e-06, %v823_v10 }
 0x593   :  { %v832_v13 = vmul.f32 %v1086_v11, %v829_v8  ;;  %vm838_vm9 = vweird.f32 %v1086_v11 }
 0x594   :  { %1087 = vrsqrt.f32 %v830_v12  ;;  %vm839_vm11 = vmor %vm837_vm10, %vm838_vm9  ;;  %vm847_vm13 = vweird.f32 %v830_v12 }
 0x595   :  { %v833_v56 = vmul.f32 %v1086_v11, %v832_v13 }
 0x597   :  { %v834_v14 = vmul.f32 0.5, %v833_v56 }
 0x599   :  { %v835_v18 = vsub.f32 1.5, %v834_v14 }
 0x59a   :  { %v1088_v19 = vpop.eup %1087 }
 0x59b   :  { %v836_v20 = vmul.f32 %v1086_v11, %v835_v18  ;;  %v842_v21 = vmul.f32 %v1088_v19, %v830_v12  ;;  %vm848_vm12 = vweird.f32 %v1088_v19 }
 0x59c   :  { %vm849_vm14 = vmor %vm847_vm13, %vm848_vm12 }
 0x59d   :  { %v840_v25 = vsel %vm839_vm11, %v1086_v11, %v836_v20  ;;  %v843_v26 = vmul.f32 %v1088_v19, %v842_v21 }
 0x59e   :  { %v851_v27 = vmul.f32 %v840_v25, %v827_v22 }
 0x59f   :  { %v844_v28 = vmul.f32 0.5, %v843_v26  ;;  %v868_v38 = vpop.permute.xlu1 %867 }
 0x5a0   :  { %v856_v29 = vadd.f32 %v1078_v23, %v851_v27 }
 0x5a1   :  { %v845_v31 = vsub.f32 1.5, %v844_v28 }
 0x5a2   :  { %v870_v32 = vmul.f32 %v863_v30, %v856_v29 }
 0x5a3   :  { %v846_v33 = vmul.f32 %v1088_v19, %v845_v31 }
 0x5a4   :  { %872 = vst.msk [vmem:[%s1452_s22] sm:$0xff] %vm95_vm1, %v870_v32 }
 0x5a5   :  { %v850_v35 = vsel %vm849_vm14, %v1088_v19, %v846_v33 }
 0x5a6   :  { %v852_v36 = vmul.f32 %v850_v35, %v828_v34 }
 0x5a8   :  { %v857_v37 = vadd.f32 %v1078_v23, %v852_v36 }
 0x5aa   :  { %v871_v39 = vmul.f32 %v868_v38, %v857_v37 }
 0x5ac   :  { %873 = vst.msk [vmem:[%s1452_s22 + $0x8] sm:$0xff] %vm95_vm1, %v871_v39 }

</bundles_post_ra>
